<compile_context>
chip_gen: v6e
topology: v6e:2x2x1
jax: 0.10.0
libtpu: 0.0.40
codegen_flags: <defaults>
</compile_context>

<pallas_src>
import functools

import jax
import jax.numpy as jnp
from jax.experimental import pallas as pl
from jax.experimental.pallas import tpu as pltpu


def _conv_gn_lrelu_kernel(x_ref, w_ref, gamma_ref, beta_ref, gmat_ref,
                          o_ref, pad_ref, *, pool, neg_slope, eps):
    """Fused [maxpool2x2] + conv3x3(pad=1, no bias) + GroupNorm + LeakyReLU.

    x_ref    : pool=True : (1, H, 2W, 2*Cin)   (free reshape of (1,2H,2W,Cin))
               pool=False: (1, H, W, Cin)
    w_ref    : (3, 3*Cin, Cout) bf16, row index = dx*Cin + cin for each dy
    gamma/beta: (1, Cout) f32
    gmat_ref : (Cout, Cout) f32; gmat[i,j] = 1/(H*W*group_size) if same group
    o_ref    : (1, H, W, Cout)
    pad_ref  : VMEM scratch (H+2, W+2, Cin) f32 — zero-padded conv input
    """
    Hp, Wp, Cin = pad_ref.shape
    H, W = Hp - 2, Wp - 2
    Cout = o_ref.shape[-1]

    # ---- max-pool 2x2 (layer 1 only) ---------------------------------------
    if pool:
        v = x_ref[0]                                    # (H, 2W, 2*Cin)
        v = jnp.maximum(v[:, :W, :], v[:, W:, :])       # vertical pair max
        xin = jnp.maximum(v[..., :Cin], v[..., Cin:])   # horizontal pair max
    else:
        xin = x_ref[0]                                  # (H, W, Cin)

    # ---- zero-pad into VMEM scratch (no HBM pad pass) ----------------------
    pad_ref[...] = jnp.zeros_like(pad_ref)
    pad_ref[1:H + 1, 1:W + 1, :] = xin.astype(pad_ref.dtype)

    # ---- 3x3 conv as 3 matmuls with K = 3*Cin (dx folded into K) -----------
    acc = jnp.zeros((H * W, Cout), jnp.float32)
    for dy in range(3):
        patch = jnp.concatenate(
            [pad_ref[dy:dy + H, dx:dx + W, :] for dx in range(3)], axis=-1)
        patch = patch.reshape(H * W, 3 * Cin).astype(jnp.bfloat16)
        acc = acc + jnp.dot(patch, w_ref[dy],
                            preferred_element_type=jnp.float32)

    # ---- GroupNorm(32) (centered two-pass variance) + LeakyReLU ------------
    gmat = gmat_ref[...]                                        # (Cout, Cout)
    ch_sum = jnp.sum(acc, axis=0, keepdims=True)                # (1, Cout)
    mean_c = jnp.dot(ch_sum, gmat, preferred_element_type=jnp.float32)
    cent = acc - mean_c
    ch_ssq = jnp.sum(cent * cent, axis=0, keepdims=True)
    var_c = jnp.dot(ch_ssq, gmat, preferred_element_type=jnp.float32)
    scale = jax.lax.rsqrt(var_c + eps) * gamma_ref[...]
    y = cent * scale + beta_ref[...]
    y = jnp.where(y > 0, y, neg_slope * y)                      # LeakyReLU
    o_ref[0] = y.reshape(H, W, Cout).astype(o_ref.dtype)


def _fused_layer(x_nhwc, w_hwio, gamma, beta, *, pool, out_dtype,
                 groups=32, eps=1e-5, neg_slope=0.01):
    """One (optional maxpool) + conv3x3 + GN(32) + LeakyReLU layer."""
    B = x_nhwc.shape[0]
    if pool:
        _, H2, W2, Cin = x_nhwc.shape
        assert H2 % 2 == 0 and W2 % 2 == 0
        H, W = H2 // 2, W2 // 2
        # Free row-major reshape: (B,2H,2W,C) -> (B,H,2W,2C).
        # axis-2 index = row_parity*W + w ; axis-3 index = col_parity*C + c.
        x_in = x_nhwc.reshape(B, H, 2 * W, 2 * Cin)
        x_spec = pl.BlockSpec((1, H, 2 * W, 2 * Cin), lambda b: (b, 0, 0, 0))
    else:
        _, H, W, Cin = x_nhwc.shape
        x_in = x_nhwc
        x_spec = pl.BlockSpec((1, H, W, Cin), lambda b: (b, 0, 0, 0))

    Cout = w_hwio.shape[-1]
    assert Cout % groups == 0, "GroupNorm(32, Cout) needs Cout % 32 == 0"
    gs = Cout // groups

    # Weights: HWIO (3,3,Cin,Cout) -> (3, 3*Cin, Cout), bf16 for the MXU.
    w9 = w_hwio.reshape(3, 3 * Cin, Cout).astype(jnp.bfloat16)
    g2 = gamma.reshape(1, Cout).astype(jnp.float32)
    b2 = beta.reshape(1, Cout).astype(jnp.float32)
    # Group-spreading matrix (hoisted out of the kernel); includes the 1/N.
    gid = jnp.arange(Cout, dtype=jnp.int32) // gs
    gmat = (gid[:, None] == gid[None, :]).astype(jnp.float32) / float(H * W * gs)

    flops = 2 * B * H * W * 9 * Cin * Cout + 4 * B * H * W * Cout
    bytes_accessed = int(x_in.size) * x_in.dtype.itemsize \
        + int(w9.size) * 2 + B * H * W * Cout * jnp.dtype(out_dtype).itemsize

    kernel = functools.partial(_conv_gn_lrelu_kernel, pool=pool,
                               neg_slope=neg_slope, eps=eps)

    # TODO(synk): for very large H*W, tile spatially (grid over H stripes with
    # GN-stat accumulation) instead of one whole image per block; the current
    # design assumes padded image + f32 accumulator fit in VMEM.
    return pl.pallas_call(
        kernel,
        out_shape=jax.ShapeDtypeStruct((B, H, W, Cout), out_dtype),
        grid=(B,),
        in_specs=[
            x_spec,
            pl.BlockSpec((3, 3 * Cin, Cout), lambda b: (0, 0, 0)),
            pl.BlockSpec((1, Cout), lambda b: (0, 0)),
            pl.BlockSpec((1, Cout), lambda b: (0, 0)),
            pl.BlockSpec((Cout, Cout), lambda b: (0, 0)),
        ],
        out_specs=pl.BlockSpec((1, H, W, Cout), lambda b: (b, 0, 0, 0)),
        scratch_shapes=[pltpu.VMEM((H + 2, W + 2, Cin), jnp.float32)],
        compiler_params=pltpu.CompilerParams(
            dimension_semantics=("parallel",)),
        cost_estimate=pl.CostEstimate(
            flops=flops, transcendentals=B * Cout,
            bytes_accessed=bytes_accessed),
    )(x_in, w9, g2, b2, gmat)


# ----------------------------------------------------------------------------
# Full `down` forward (NCHW in / NCHW out, like the PyTorch module).
# ----------------------------------------------------------------------------
def down_forward(x_nchw, params):
    x = jnp.transpose(x_nchw, (0, 2, 3, 1))            # NCHW -> NHWC
    # maxpool(2) is fused into the first conv; inter-layer activation in bf16.
    h = _fused_layer(x, params["w1"], params["g1"], params["b1"],
                     pool=True, out_dtype=jnp.bfloat16)
    y = _fused_layer(h, params["w2"], params["g2"], params["b2"],
                     pool=False, out_dtype=x_nchw.dtype)
    return jnp.transpose(y, (0, 3, 1, 2))               # NHWC -> NCHW


def init_params(key, in_ch, out_ch):
    k1, k2 = jax.random.split(key)
    return {
        # Conv2d weights stored HWIO: [3, 3, Cin, Cout] (no bias).
        "w1": 0.05 * jax.random.normal(k1, (3, 3, in_ch, out_ch), jnp.float32),
        "w2": 0.05 * jax.random.normal(k2, (3, 3, out_ch, out_ch), jnp.float32),
        # GroupNorm affine params (PyTorch default init: weight=1, bias=0).
        "g1": jnp.ones((out_ch,), jnp.float32),
        "b1": jnp.zeros((out_ch,), jnp.float32),
        "g2": jnp.ones((out_ch,), jnp.float32),
        "b2": jnp.zeros((out_ch,), jnp.float32),
    }


if __name__ == "__main__":
    # GroupNorm(32, out_ch) requires out_ch % 32 == 0; out_ch=128 keeps the
    # channel (lane) axis fully dense, typical of a U-Net down(64, 128) block.
    in_ch, out_ch = 64, 128
    B, H, W = 2, 16, 16

    key = jax.random.PRNGKey(0)
    kx, kp = jax.random.split(key)
    x = jax.random.normal(kx, (B, in_ch, H, W), jnp.float32)   # NCHW
    params = init_params(kp, in_ch, out_ch)

    out = jax.jit(down_forward)(x, params)
    out = jax.block_until_ready(out)

    assert out.shape == (B, out_ch, H // 2, W // 2), out.shape
    assert bool(jnp.all(jnp.isfinite(out)))
    print("KERNEL_OK")
</pallas_src>

<mosaic_0001>
module attributes {stable_mosaic.version = 11 : i64} {
  func.func @_conv_gn_lrelu_kernel(%arg0: i32, %arg1: memref<1x8x16x128xf32, #tpu.memory_space<vmem>>, %arg2: memref<3x192x128xbf16, #tpu.memory_space<vmem>>, %arg3: memref<1x128xf32, #tpu.memory_space<vmem>>, %arg4: memref<1x128xf32, #tpu.memory_space<vmem>>, %arg5: memref<128x128xf32, #tpu.memory_space<vmem>>, %arg6: memref<1x8x8x128xbf16, #tpu.memory_space<vmem>>, %arg7: memref<10x10x64xf32, #tpu.memory_space<vmem>>) attributes {dimension_semantics = [#tpu.dimension_semantics<parallel>], iteration_bounds = array<i64: 2>, scalar_prefetch = 0 : i64, scratch_operands = 1 : i64, tpu.core_type = #tpu.core_type<tc>, window_params = [{transform_indices = @transform_0, window_bounds = array<i64: 1, 8, 16, 128>}, {pipeline_mode = #tpu.pipeline_mode<synchronous>, transform_indices = @transform_1, window_bounds = array<i64: 3, 192, 128>}, {pipeline_mode = #tpu.pipeline_mode<synchronous>, transform_indices = @transform_2, window_bounds = array<i64: 1, 128>}, {pipeline_mode = #tpu.pipeline_mode<synchronous>, transform_indices = @transform_3, window_bounds = array<i64: 1, 128>}, {pipeline_mode = #tpu.pipeline_mode<synchronous>, transform_indices = @transform_4, window_bounds = array<i64: 128, 128>}, {transform_indices = @transform_5, window_bounds = array<i64: 1, 8, 8, 128>}]} {
    %c0 = arith.constant 0 : index
    %c0_0 = arith.constant 0 : index
    %c0_1 = arith.constant 0 : index
    %c0_2 = arith.constant 0 : index
    %0 = vector.load %arg1[%c0, %c0_0, %c0_1, %c0_2] : memref<1x8x16x128xf32, #tpu.memory_space<vmem>>, vector<1x8x16x128xf32>
    %1 = vector.shape_cast %0 : vector<1x8x16x128xf32> to vector<8x16x128xf32>
    %2 = vector.extract_strided_slice %1 {offsets = [0, 0, 0], sizes = [8, 8, 128], strides = [1, 1, 1]} : vector<8x16x128xf32> to vector<8x8x128xf32>
    %3 = vector.extract_strided_slice %1 {offsets = [0, 8, 0], sizes = [8, 8, 128], strides = [1, 1, 1]} : vector<8x16x128xf32> to vector<8x8x128xf32>
    %4 = arith.maximumf %2, %3 : vector<8x8x128xf32>
    %5 = vector.extract_strided_slice %4 {offsets = [0, 0, 0], sizes = [8, 8, 64], strides = [1, 1, 1]} : vector<8x8x128xf32> to vector<8x8x64xf32>
    %6 = vector.extract_strided_slice %4 {offsets = [0, 0, 64], sizes = [8, 8, 64], strides = [1, 1, 1]} : vector<8x8x128xf32> to vector<8x8x64xf32>
    %7 = arith.maximumf %5, %6 : vector<8x8x64xf32>
    %cst = arith.constant 0.000000e+00 : f32
    %8 = vector.broadcast %cst : f32 to vector<10x10x64xf32>
    %c0_3 = arith.constant 0 : index
    %c0_4 = arith.constant 0 : index
    %c0_5 = arith.constant 0 : index
    %9 = vector.load %arg7[%c0_3, %c0_4, %c0_5] : memref<10x10x64xf32, #tpu.memory_space<vmem>>, vector<10x10x64xf32>
    tpu.vector_store %arg7[%c0_3, %c0_4, %c0_5], %8 {strides = array<i32>} : memref<10x10x64xf32, #tpu.memory_space<vmem>>, vector<10x10x64xf32>,
    %c1 = arith.constant 1 : index
    %c1_6 = arith.constant 1 : index
    %c0_7 = arith.constant 0 : index
    %10 = vector.load %arg7[%c1, %c1_6, %c0_7] : memref<10x10x64xf32, #tpu.memory_space<vmem>>, vector<8x8x64xf32>
    tpu.vector_store %arg7[%c1, %c1_6, %c0_7], %7 {strides = array<i32>} : memref<10x10x64xf32, #tpu.memory_space<vmem>>, vector<8x8x64xf32>,
    %cst_8 = arith.constant 0.000000e+00 : f32
    %11 = vector.broadcast %cst_8 : f32 to vector<64x128xf32>
    %c0_9 = arith.constant 0 : index
    %c0_10 = arith.constant 0 : index
    %c0_11 = arith.constant 0 : index
    %12 = vector.load %arg7[%c0_9, %c0_10, %c0_11] : memref<10x10x64xf32, #tpu.memory_space<vmem>>, vector<8x8x64xf32>
    %c0_12 = arith.constant 0 : index
    %c1_13 = arith.constant 1 : index
    %c0_14 = arith.constant 0 : index
    %13 = vector.load %arg7[%c0_12, %c1_13, %c0_14] : memref<10x10x64xf32, #tpu.memory_space<vmem>>, vector<8x8x64xf32>
    %c0_15 = arith.constant 0 : index
    %c2 = arith.constant 2 : index
    %c0_16 = arith.constant 0 : index
    %14 = vector.load %arg7[%c0_15, %c2, %c0_16] : memref<10x10x64xf32, #tpu.memory_space<vmem>>, vector<8x8x64xf32>
    %15 = tpu.concatenate %12, %13, %14 in 2 : vector<8x8x64xf32>, vector<8x8x64xf32>, vector<8x8x64xf32> -> vector<8x8x192xf32>
    %16 = vector.shape_cast %15 : vector<8x8x192xf32> to vector<64x192xf32>
    %17 = arith.truncf %16 : vector<64x192xf32> to vector<64x192xbf16>
    %c0_17 = arith.constant 0 : index
    %c0_18 = arith.constant 0 : index
    %c0_19 = arith.constant 0 : index
    %18 = vector.load %arg2[%c0_17, %c0_18, %c0_19] : memref<3x192x128xbf16, #tpu.memory_space<vmem>>, vector<1x192x128xbf16>
    %19 = vector.shape_cast %18 : vector<1x192x128xbf16> to vector<192x128xbf16>
    %cst_20 = arith.constant dense<0.000000e+00> : vector<64x128xf32>
    %20 = tpu.matmul %17, %19, %cst_20 {dimension_numbers = #tpu.dot_dimension_numbers<[1], [0], [0], [1], [0, 0, 1, 1], [], []>} : vector<64x192xbf16>, vector<192x128xbf16>, vector<64x128xf32> -> vector<64x128xf32>
    %21 = arith.addf %11, %20 : vector<64x128xf32>
    %c1_21 = arith.constant 1 : index
    %c0_22 = arith.constant 0 : index
    %c0_23 = arith.constant 0 : index
    %22 = vector.load %arg7[%c1_21, %c0_22, %c0_23] : memref<10x10x64xf32, #tpu.memory_space<vmem>>, vector<8x8x64xf32>
    %c1_24 = arith.constant 1 : index
    %c1_25 = arith.constant 1 : index
    %c0_26 = arith.constant 0 : index
    %23 = vector.load %arg7[%c1_24, %c1_25, %c0_26] : memref<10x10x64xf32, #tpu.memory_space<vmem>>, vector<8x8x64xf32>
    %c1_27 = arith.constant 1 : index
    %c2_28 = arith.constant 2 : index
    %c0_29 = arith.constant 0 : index
    %24 = vector.load %arg7[%c1_27, %c2_28, %c0_29] : memref<10x10x64xf32, #tpu.memory_space<vmem>>, vector<8x8x64xf32>
    %25 = tpu.concatenate %22, %23, %24 in 2 : vector<8x8x64xf32>, vector<8x8x64xf32>, vector<8x8x64xf32> -> vector<8x8x192xf32>
    %26 = vector.shape_cast %25 : vector<8x8x192xf32> to vector<64x192xf32>
    %27 = arith.truncf %26 : vector<64x192xf32> to vector<64x192xbf16>
    %c1_30 = arith.constant 1 : index
    %c0_31 = arith.constant 0 : index
    %c0_32 = arith.constant 0 : index
    %28 = vector.load %arg2[%c1_30, %c0_31, %c0_32] : memref<3x192x128xbf16, #tpu.memory_space<vmem>>, vector<1x192x128xbf16>
    %29 = vector.shape_cast %28 : vector<1x192x128xbf16> to vector<192x128xbf16>
    %cst_33 = arith.constant dense<0.000000e+00> : vector<64x128xf32>
    %30 = tpu.matmul %27, %29, %cst_33 {dimension_numbers = #tpu.dot_dimension_numbers<[1], [0], [0], [1], [0, 0, 1, 1], [], []>} : vector<64x192xbf16>, vector<192x128xbf16>, vector<64x128xf32> -> vector<64x128xf32>
    %31 = arith.addf %21, %30 : vector<64x128xf32>
    %c2_34 = arith.constant 2 : index
    %c0_35 = arith.constant 0 : index
    %c0_36 = arith.constant 0 : index
    %32 = vector.load %arg7[%c2_34, %c0_35, %c0_36] : memref<10x10x64xf32, #tpu.memory_space<vmem>>, vector<8x8x64xf32>
    %c2_37 = arith.constant 2 : index
    %c1_38 = arith.constant 1 : index
    %c0_39 = arith.constant 0 : index
    %33 = vector.load %arg7[%c2_37, %c1_38, %c0_39] : memref<10x10x64xf32, #tpu.memory_space<vmem>>, vector<8x8x64xf32>
    %c2_40 = arith.constant 2 : index
    %c2_41 = arith.constant 2 : index
    %c0_42 = arith.constant 0 : index
    %34 = vector.load %arg7[%c2_40, %c2_41, %c0_42] : memref<10x10x64xf32, #tpu.memory_space<vmem>>, vector<8x8x64xf32>
    %35 = tpu.concatenate %32, %33, %34 in 2 : vector<8x8x64xf32>, vector<8x8x64xf32>, vector<8x8x64xf32> -> vector<8x8x192xf32>
    %36 = vector.shape_cast %35 : vector<8x8x192xf32> to vector<64x192xf32>
    %37 = arith.truncf %36 : vector<64x192xf32> to vector<64x192xbf16>
    %c2_43 = arith.constant 2 : index
    %c0_44 = arith.constant 0 : index
    %c0_45 = arith.constant 0 : index
    %38 = vector.load %arg2[%c2_43, %c0_44, %c0_45] : memref<3x192x128xbf16, #tpu.memory_space<vmem>>, vector<1x192x128xbf16>
    %39 = vector.shape_cast %38 : vector<1x192x128xbf16> to vector<192x128xbf16>
    %cst_46 = arith.constant dense<0.000000e+00> : vector<64x128xf32>
    %40 = tpu.matmul %37, %39, %cst_46 {dimension_numbers = #tpu.dot_dimension_numbers<[1], [0], [0], [1], [0, 0, 1, 1], [], []>} : vector<64x192xbf16>, vector<192x128xbf16>, vector<64x128xf32> -> vector<64x128xf32>
    %41 = arith.addf %31, %40 : vector<64x128xf32>
    %c0_47 = arith.constant 0 : index
    %c0_48 = arith.constant 0 : index
    %42 = vector.load %arg5[%c0_47, %c0_48] : memref<128x128xf32, #tpu.memory_space<vmem>>, vector<128x128xf32>
    %cst_49 = arith.constant dense<0.000000e+00> : vector<128xf32>
    %43 = vector.multi_reduction <add>, %41, %cst_49 [0] : vector<64x128xf32> to vector<128xf32>
    %44 = vector.shape_cast %43 : vector<128xf32> to vector<1x128xf32>
    %cst_50 = arith.constant dense<0.000000e+00> : vector<1x128xf32>
    %45 = tpu.matmul %44, %42, %cst_50 {dimension_numbers = #tpu.dot_dimension_numbers<[1], [0], [0], [1], [0, 0, 1, 1], [], []>} : vector<1x128xf32>, vector<128x128xf32>, vector<1x128xf32> -> vector<1x128xf32>
    %46 = vector.broadcast %45 : vector<1x128xf32> to vector<64x128xf32>
    %47 = arith.subf %41, %46 : vector<64x128xf32>
    %48 = arith.mulf %47, %47 : vector<64x128xf32>
    %cst_51 = arith.constant dense<0.000000e+00> : vector<128xf32>
    %49 = vector.multi_reduction <add>, %48, %cst_51 [0] : vector<64x128xf32> to vector<128xf32>
    %50 = vector.shape_cast %49 : vector<128xf32> to vector<1x128xf32>
    %cst_52 = arith.constant dense<0.000000e+00> : vector<1x128xf32>
    %51 = tpu.matmul %50, %42, %cst_52 {dimension_numbers = #tpu.dot_dimension_numbers<[1], [0], [0], [1], [0, 0, 1, 1], [], []>} : vector<1x128xf32>, vector<128x128xf32>, vector<1x128xf32> -> vector<1x128xf32>
    %cst_53 = arith.constant 9.99999974E-6 : f32
    %52 = vector.broadcast %cst_53 : f32 to vector<1x128xf32>
    %53 = arith.addf %51, %52 : vector<1x128xf32>
    %54 = math.rsqrt %53 : vector<1x128xf32>
    %c0_54 = arith.constant 0 : index
    %c0_55 = arith.constant 0 : index
    %55 = vector.load %arg3[%c0_54, %c0_55] : memref<1x128xf32, #tpu.memory_space<vmem>>, vector<1x128xf32>
    %56 = arith.mulf %54, %55 : vector<1x128xf32>
    %57 = vector.broadcast %56 : vector<1x128xf32> to vector<64x128xf32>
    %58 = arith.mulf %47, %57 : vector<64x128xf32>
    %c0_56 = arith.constant 0 : index
    %c0_57 = arith.constant 0 : index
    %59 = vector.load %arg4[%c0_56, %c0_57] : memref<1x128xf32, #tpu.memory_space<vmem>>, vector<1x128xf32>
    %60 = vector.broadcast %59 : vector<1x128xf32> to vector<64x128xf32>
    %61 = arith.addf %58, %60 : vector<64x128xf32>
    %cst_58 = arith.constant 0.000000e+00 : f32
    %62 = vector.broadcast %cst_58 : f32 to vector<64x128xf32>
    %63 = arith.cmpf ogt, %61, %62 : vector<64x128xf32>
    %cst_59 = arith.constant 0.00999999977 : f32
    %64 = vector.broadcast %cst_59 : f32 to vector<64x128xf32>
    %65 = arith.mulf %64, %61 : vector<64x128xf32>
    %66 = arith.select %63, %61, %65 : vector<64x128xi1>, vector<64x128xf32>
    %67 = vector.shape_cast %66 : vector<64x128xf32> to vector<8x8x128xf32>
    %68 = arith.truncf %67 : vector<8x8x128xf32> to vector<8x8x128xbf16>
    %c0_60 = arith.constant 0 : index
    %c0_61 = arith.constant 0 : index
    %c0_62 = arith.constant 0 : index
    %c0_63 = arith.constant 0 : index
    %69 = vector.load %arg6[%c0_60, %c0_61, %c0_62, %c0_63] : memref<1x8x8x128xbf16, #tpu.memory_space<vmem>>, vector<1x8x8x128xbf16>
    %70 = vector.shape_cast %69 : vector<1x8x8x128xbf16> to vector<8x8x128xbf16>
    %71 = vector.shape_cast %68 : vector<8x8x128xbf16> to vector<1x8x8x128xbf16>
    tpu.vector_store %arg6[%c0_60, %c0_61, %c0_62, %c0_63], %71 {strides = array<i32>} : memref<1x8x8x128xbf16, #tpu.memory_space<vmem>>, vector<1x8x8x128xbf16>,
    return
  }
  func.func @transform_0(%arg0: i32) -> (i32, i32, i32, i32) {
    %c0_i32 = arith.constant 0 : i32
    %c0_i32_0 = arith.constant 0 : i32
    %c0_i32_1 = arith.constant 0 : i32
    %c0_i32_2 = arith.constant 0 : i32
    return %arg0, %c0_i32, %c0_i32_0, %c0_i32_1 : i32, i32, i32, i32
  }
  func.func @transform_1(%arg0: i32) -> (i32, i32, i32) {
    %c0_i32 = arith.constant 0 : i32
    %c0_i32_0 = arith.constant 0 : i32
    %c0_i32_1 = arith.constant 0 : i32
    %c0_i32_2 = arith.constant 0 : i32
    return %c0_i32, %c0_i32_0, %c0_i32_1 : i32, i32, i32
  }
  func.func @transform_2(%arg0: i32) -> (i32, i32) {
    %c0_i32 = arith.constant 0 : i32
    %c0_i32_0 = arith.constant 0 : i32
    %c0_i32_1 = arith.constant 0 : i32
    return %c0_i32, %c0_i32_0 : i32, i32
  }
  func.func @transform_3(%arg0: i32) -> (i32, i32) {
    %c0_i32 = arith.constant 0 : i32
    %c0_i32_0 = arith.constant 0 : i32
    %c0_i32_1 = arith.constant 0 : i32
    return %c0_i32, %c0_i32_0 : i32, i32
  }
  func.func @transform_4(%arg0: i32) -> (i32, i32) {
    %c0_i32 = arith.constant 0 : i32
    %c0_i32_0 = arith.constant 0 : i32
    %c0_i32_1 = arith.constant 0 : i32
    return %c0_i32, %c0_i32_0 : i32, i32
  }
  func.func @transform_5(%arg0: i32) -> (i32, i32, i32, i32) {
    %c0_i32 = arith.constant 0 : i32
    %c0_i32_0 = arith.constant 0 : i32
    %c0_i32_1 = arith.constant 0 : i32
    %c0_i32_2 = arith.constant 0 : i32
    return %arg0, %c0_i32, %c0_i32_0, %c0_i32_1 : i32, i32, i32, i32
  }
}

module attributes {stable_mosaic.version = 11 : i64} {
  func.func @_conv_gn_lrelu_kernel(%arg0: i32, %arg1: memref<1x8x8x128xbf16, #tpu.memory_space<vmem>>, %arg2: memref<3x384x128xbf16, #tpu.memory_space<vmem>>, %arg3: memref<1x128xf32, #tpu.memory_space<vmem>>, %arg4: memref<1x128xf32, #tpu.memory_space<vmem>>, %arg5: memref<128x128xf32, #tpu.memory_space<vmem>>, %arg6: memref<1x8x8x128xf32, #tpu.memory_space<vmem>>, %arg7: memref<10x10x128xf32, #tpu.memory_space<vmem>>) attributes {dimension_semantics = [#tpu.dimension_semantics<parallel>], iteration_bounds = array<i64: 2>, scalar_prefetch = 0 : i64, scratch_operands = 1 : i64, tpu.core_type = #tpu.core_type<tc>, window_params = [{transform_indices = @transform_0, window_bounds = array<i64: 1, 8, 8, 128>}, {pipeline_mode = #tpu.pipeline_mode<synchronous>, transform_indices = @transform_1, window_bounds = array<i64: 3, 384, 128>}, {pipeline_mode = #tpu.pipeline_mode<synchronous>, transform_indices = @transform_2, window_bounds = array<i64: 1, 128>}, {pipeline_mode = #tpu.pipeline_mode<synchronous>, transform_indices = @transform_3, window_bounds = array<i64: 1, 128>}, {pipeline_mode = #tpu.pipeline_mode<synchronous>, transform_indices = @transform_4, window_bounds = array<i64: 128, 128>}, {transform_indices = @transform_5, window_bounds = array<i64: 1, 8, 8, 128>}]} {
    %c0 = arith.constant 0 : index
    %c0_0 = arith.constant 0 : index
    %c0_1 = arith.constant 0 : index
    %c0_2 = arith.constant 0 : index
    %0 = vector.load %arg1[%c0, %c0_0, %c0_1, %c0_2] : memref<1x8x8x128xbf16, #tpu.memory_space<vmem>>, vector<1x8x8x128xbf16>
    %1 = vector.shape_cast %0 : vector<1x8x8x128xbf16> to vector<8x8x128xbf16>
    %cst = arith.constant 0.000000e+00 : f32
    %2 = vector.broadcast %cst : f32 to vector<10x10x128xf32>
    %c0_3 = arith.constant 0 : index
    %c0_4 = arith.constant 0 : index
    %c0_5 = arith.constant 0 : index
    %3 = vector.load %arg7[%c0_3, %c0_4, %c0_5] : memref<10x10x128xf32, #tpu.memory_space<vmem>>, vector<10x10x128xf32>
    tpu.vector_store %arg7[%c0_3, %c0_4, %c0_5], %2 {strides = array<i32>} : memref<10x10x128xf32, #tpu.memory_space<vmem>>, vector<10x10x128xf32>,
    %4 = arith.extf %1 : vector<8x8x128xbf16> to vector<8x8x128xf32>
    %c1 = arith.constant 1 : index
    %c1_6 = arith.constant 1 : index
    %c0_7 = arith.constant 0 : index
    %5 = vector.load %arg7[%c1, %c1_6, %c0_7] : memref<10x10x128xf32, #tpu.memory_space<vmem>>, vector<8x8x128xf32>
    tpu.vector_store %arg7[%c1, %c1_6, %c0_7], %4 {strides = array<i32>} : memref<10x10x128xf32, #tpu.memory_space<vmem>>, vector<8x8x128xf32>,
    %cst_8 = arith.constant 0.000000e+00 : f32
    %6 = vector.broadcast %cst_8 : f32 to vector<64x128xf32>
    %c0_9 = arith.constant 0 : index
    %c0_10 = arith.constant 0 : index
    %c0_11 = arith.constant 0 : index
    %7 = vector.load %arg7[%c0_9, %c0_10, %c0_11] : memref<10x10x128xf32, #tpu.memory_space<vmem>>, vector<8x8x128xf32>
    %c0_12 = arith.constant 0 : index
    %c1_13 = arith.constant 1 : index
    %c0_14 = arith.constant 0 : index
    %8 = vector.load %arg7[%c0_12, %c1_13, %c0_14] : memref<10x10x128xf32, #tpu.memory_space<vmem>>, vector<8x8x128xf32>
    %c0_15 = arith.constant 0 : index
    %c2 = arith.constant 2 : index
    %c0_16 = arith.constant 0 : index
    %9 = vector.load %arg7[%c0_15, %c2, %c0_16] : memref<10x10x128xf32, #tpu.memory_space<vmem>>, vector<8x8x128xf32>
    %10 = tpu.concatenate %7, %8, %9 in 2 : vector<8x8x128xf32>, vector<8x8x128xf32>, vector<8x8x128xf32> -> vector<8x8x384xf32>
    %11 = vector.shape_cast %10 : vector<8x8x384xf32> to vector<64x384xf32>
    %12 = arith.truncf %11 : vector<64x384xf32> to vector<64x384xbf16>
    %c0_17 = arith.constant 0 : index
    %c0_18 = arith.constant 0 : index
    %c0_19 = arith.constant 0 : index
    %13 = vector.load %arg2[%c0_17, %c0_18, %c0_19] : memref<3x384x128xbf16, #tpu.memory_space<vmem>>, vector<1x384x128xbf16>
    %14 = vector.shape_cast %13 : vector<1x384x128xbf16> to vector<384x128xbf16>
    %cst_20 = arith.constant dense<0.000000e+00> : vector<64x128xf32>
    %15 = tpu.matmul %12, %14, %cst_20 {dimension_numbers = #tpu.dot_dimension_numbers<[1], [0], [0], [1], [0, 0, 1, 1], [], []>} : vector<64x384xbf16>, vector<384x128xbf16>, vector<64x128xf32> -> vector<64x128xf32>
    %16 = arith.addf %6, %15 : vector<64x128xf32>
    %c1_21 = arith.constant 1 : index
    %c0_22 = arith.constant 0 : index
    %c0_23 = arith.constant 0 : index
    %17 = vector.load %arg7[%c1_21, %c0_22, %c0_23] : memref<10x10x128xf32, #tpu.memory_space<vmem>>, vector<8x8x128xf32>
    %c1_24 = arith.constant 1 : index
    %c1_25 = arith.constant 1 : index
    %c0_26 = arith.constant 0 : index
    %18 = vector.load %arg7[%c1_24, %c1_25, %c0_26] : memref<10x10x128xf32, #tpu.memory_space<vmem>>, vector<8x8x128xf32>
    %c1_27 = arith.constant 1 : index
    %c2_28 = arith.constant 2 : index
    %c0_29 = arith.constant 0 : index
    %19 = vector.load %arg7[%c1_27, %c2_28, %c0_29] : memref<10x10x128xf32, #tpu.memory_space<vmem>>, vector<8x8x128xf32>
    %20 = tpu.concatenate %17, %18, %19 in 2 : vector<8x8x128xf32>, vector<8x8x128xf32>, vector<8x8x128xf32> -> vector<8x8x384xf32>
    %21 = vector.shape_cast %20 : vector<8x8x384xf32> to vector<64x384xf32>
    %22 = arith.truncf %21 : vector<64x384xf32> to vector<64x384xbf16>
    %c1_30 = arith.constant 1 : index
    %c0_31 = arith.constant 0 : index
    %c0_32 = arith.constant 0 : index
    %23 = vector.load %arg2[%c1_30, %c0_31, %c0_32] : memref<3x384x128xbf16, #tpu.memory_space<vmem>>, vector<1x384x128xbf16>
    %24 = vector.shape_cast %23 : vector<1x384x128xbf16> to vector<384x128xbf16>
    %cst_33 = arith.constant dense<0.000000e+00> : vector<64x128xf32>
    %25 = tpu.matmul %22, %24, %cst_33 {dimension_numbers = #tpu.dot_dimension_numbers<[1], [0], [0], [1], [0, 0, 1, 1], [], []>} : vector<64x384xbf16>, vector<384x128xbf16>, vector<64x128xf32> -> vector<64x128xf32>
    %26 = arith.addf %16, %25 : vector<64x128xf32>
    %c2_34 = arith.constant 2 : index
    %c0_35 = arith.constant 0 : index
    %c0_36 = arith.constant 0 : index
    %27 = vector.load %arg7[%c2_34, %c0_35, %c0_36] : memref<10x10x128xf32, #tpu.memory_space<vmem>>, vector<8x8x128xf32>
    %c2_37 = arith.constant 2 : index
    %c1_38 = arith.constant 1 : index
    %c0_39 = arith.constant 0 : index
    %28 = vector.load %arg7[%c2_37, %c1_38, %c0_39] : memref<10x10x128xf32, #tpu.memory_space<vmem>>, vector<8x8x128xf32>
    %c2_40 = arith.constant 2 : index
    %c2_41 = arith.constant 2 : index
    %c0_42 = arith.constant 0 : index
    %29 = vector.load %arg7[%c2_40, %c2_41, %c0_42] : memref<10x10x128xf32, #tpu.memory_space<vmem>>, vector<8x8x128xf32>
    %30 = tpu.concatenate %27, %28, %29 in 2 : vector<8x8x128xf32>, vector<8x8x128xf32>, vector<8x8x128xf32> -> vector<8x8x384xf32>
    %31 = vector.shape_cast %30 : vector<8x8x384xf32> to vector<64x384xf32>
    %32 = arith.truncf %31 : vector<64x384xf32> to vector<64x384xbf16>
    %c2_43 = arith.constant 2 : index
    %c0_44 = arith.constant 0 : index
    %c0_45 = arith.constant 0 : index
    %33 = vector.load %arg2[%c2_43, %c0_44, %c0_45] : memref<3x384x128xbf16, #tpu.memory_space<vmem>>, vector<1x384x128xbf16>
    %34 = vector.shape_cast %33 : vector<1x384x128xbf16> to vector<384x128xbf16>
    %cst_46 = arith.constant dense<0.000000e+00> : vector<64x128xf32>
    %35 = tpu.matmul %32, %34, %cst_46 {dimension_numbers = #tpu.dot_dimension_numbers<[1], [0], [0], [1], [0, 0, 1, 1], [], []>} : vector<64x384xbf16>, vector<384x128xbf16>, vector<64x128xf32> -> vector<64x128xf32>
    %36 = arith.addf %26, %35 : vector<64x128xf32>
    %c0_47 = arith.constant 0 : index
    %c0_48 = arith.constant 0 : index
    %37 = vector.load %arg5[%c0_47, %c0_48] : memref<128x128xf32, #tpu.memory_space<vmem>>, vector<128x128xf32>
    %cst_49 = arith.constant dense<0.000000e+00> : vector<128xf32>
    %38 = vector.multi_reduction <add>, %36, %cst_49 [0] : vector<64x128xf32> to vector<128xf32>
    %39 = vector.shape_cast %38 : vector<128xf32> to vector<1x128xf32>
    %cst_50 = arith.constant dense<0.000000e+00> : vector<1x128xf32>
    %40 = tpu.matmul %39, %37, %cst_50 {dimension_numbers = #tpu.dot_dimension_numbers<[1], [0], [0], [1], [0, 0, 1, 1], [], []>} : vector<1x128xf32>, vector<128x128xf32>, vector<1x128xf32> -> vector<1x128xf32>
    %41 = vector.broadcast %40 : vector<1x128xf32> to vector<64x128xf32>
    %42 = arith.subf %36, %41 : vector<64x128xf32>
    %43 = arith.mulf %42, %42 : vector<64x128xf32>
    %cst_51 = arith.constant dense<0.000000e+00> : vector<128xf32>
    %44 = vector.multi_reduction <add>, %43, %cst_51 [0] : vector<64x128xf32> to vector<128xf32>
    %45 = vector.shape_cast %44 : vector<128xf32> to vector<1x128xf32>
    %cst_52 = arith.constant dense<0.000000e+00> : vector<1x128xf32>
    %46 = tpu.matmul %45, %37, %cst_52 {dimension_numbers = #tpu.dot_dimension_numbers<[1], [0], [0], [1], [0, 0, 1, 1], [], []>} : vector<1x128xf32>, vector<128x128xf32>, vector<1x128xf32> -> vector<1x128xf32>
    %cst_53 = arith.constant 9.99999974E-6 : f32
    %47 = vector.broadcast %cst_53 : f32 to vector<1x128xf32>
    %48 = arith.addf %46, %47 : vector<1x128xf32>
    %49 = math.rsqrt %48 : vector<1x128xf32>
    %c0_54 = arith.constant 0 : index
    %c0_55 = arith.constant 0 : index
    %50 = vector.load %arg3[%c0_54, %c0_55] : memref<1x128xf32, #tpu.memory_space<vmem>>, vector<1x128xf32>
    %51 = arith.mulf %49, %50 : vector<1x128xf32>
    %52 = vector.broadcast %51 : vector<1x128xf32> to vector<64x128xf32>
    %53 = arith.mulf %42, %52 : vector<64x128xf32>
    %c0_56 = arith.constant 0 : index
    %c0_57 = arith.constant 0 : index
    %54 = vector.load %arg4[%c0_56, %c0_57] : memref<1x128xf32, #tpu.memory_space<vmem>>, vector<1x128xf32>
    %55 = vector.broadcast %54 : vector<1x128xf32> to vector<64x128xf32>
    %56 = arith.addf %53, %55 : vector<64x128xf32>
    %cst_58 = arith.constant 0.000000e+00 : f32
    %57 = vector.broadcast %cst_58 : f32 to vector<64x128xf32>
    %58 = arith.cmpf ogt, %56, %57 : vector<64x128xf32>
    %cst_59 = arith.constant 0.00999999977 : f32
    %59 = vector.broadcast %cst_59 : f32 to vector<64x128xf32>
    %60 = arith.mulf %59, %56 : vector<64x128xf32>
    %61 = arith.select %58, %56, %60 : vector<64x128xi1>, vector<64x128xf32>
    %62 = vector.shape_cast %61 : vector<64x128xf32> to vector<8x8x128xf32>
    %c0_60 = arith.constant 0 : index
    %c0_61 = arith.constant 0 : index
    %c0_62 = arith.constant 0 : index
    %c0_63 = arith.constant 0 : index
    %63 = vector.load %arg6[%c0_60, %c0_61, %c0_62, %c0_63] : memref<1x8x8x128xf32, #tpu.memory_space<vmem>>, vector<1x8x8x128xf32>
    %64 = vector.shape_cast %63 : vector<1x8x8x128xf32> to vector<8x8x128xf32>
    %65 = vector.shape_cast %62 : vector<8x8x128xf32> to vector<1x8x8x128xf32>
    tpu.vector_store %arg6[%c0_60, %c0_61, %c0_62, %c0_63], %65 {strides = array<i32>} : memref<1x8x8x128xf32, #tpu.memory_space<vmem>>, vector<1x8x8x128xf32>,
    return
  }
  func.func @transform_0(%arg0: i32) -> (i32, i32, i32, i32) {
    %c0_i32 = arith.constant 0 : i32
    %c0_i32_0 = arith.constant 0 : i32
    %c0_i32_1 = arith.constant 0 : i32
    %c0_i32_2 = arith.constant 0 : i32
    return %arg0, %c0_i32, %c0_i32_0, %c0_i32_1 : i32, i32, i32, i32
  }
  func.func @transform_1(%arg0: i32) -> (i32, i32, i32) {
    %c0_i32 = arith.constant 0 : i32
    %c0_i32_0 = arith.constant 0 : i32
    %c0_i32_1 = arith.constant 0 : i32
    %c0_i32_2 = arith.constant 0 : i32
    return %c0_i32, %c0_i32_0, %c0_i32_1 : i32, i32, i32
  }
  func.func @transform_2(%arg0: i32) -> (i32, i32) {
    %c0_i32 = arith.constant 0 : i32
    %c0_i32_0 = arith.constant 0 : i32
    %c0_i32_1 = arith.constant 0 : i32
    return %c0_i32, %c0_i32_0 : i32, i32
  }
  func.func @transform_3(%arg0: i32) -> (i32, i32) {
    %c0_i32 = arith.constant 0 : i32
    %c0_i32_0 = arith.constant 0 : i32
    %c0_i32_1 = arith.constant 0 : i32
    return %c0_i32, %c0_i32_0 : i32, i32
  }
  func.func @transform_4(%arg0: i32) -> (i32, i32) {
    %c0_i32 = arith.constant 0 : i32
    %c0_i32_0 = arith.constant 0 : i32
    %c0_i32_1 = arith.constant 0 : i32
    return %c0_i32, %c0_i32_0 : i32, i32
  }
  func.func @transform_5(%arg0: i32) -> (i32, i32, i32, i32) {
    %c0_i32 = arith.constant 0 : i32
    %c0_i32_0 = arith.constant 0 : i32
    %c0_i32_1 = arith.constant 0 : i32
    %c0_i32_2 = arith.constant 0 : i32
    return %arg0, %c0_i32, %c0_i32_0, %c0_i32_1 : i32, i32, i32, i32
  }
}

</mosaic_0001>

<bundles_post_ra>
// kernel: down_forward.2
= control target key start
LH: loop header
LB: loop body
LE: loop exit
PB: predicated region body
PF: predicated region fallthrough
CT: control target
= control target key end

     0   :  { %s1783_s18 = smov 0   ;;  %s2329_s0 = inlined_call_operand.vmem [shape: f32[2,8,16,128], index: 0, kind: input, shape index: {}]   ;;  %s2330_s1 = inlined_call_operand.vmem [shape: bf16[3,192,128], index: 1, kind: input, shape index: {}]   ;;  %s2331_s2 = inlined_call_operand.vmem [shape: f32[1,128], index: 2, kind: input, shape index: {}]   ;;  %s2332_s3 = inlined_call_operand.vmem [shape: f32[1,128], index: 3, kind: input, shape index: {}]   ;;  %s2333_s4 = inlined_call_operand.vmem [shape: f32[128,128], index: 4, kind: input, shape index: {}]   ;;  %s2334_s5 = inlined_call_operand.vmem [shape: bf16[2,8,8,128], index: 5, kind: output, shape index: {}]  }
   0x1 LB: > { %s1394_s19 = sadd.s32 4294967295, %s1747_s18   ;;  %p1398_p0 = scmp.ge.s32.totalorder %s1747_s18, 1  ;;  %s1747_s18 = sphi %s1783_s18, %s15_s18  }
   0x2   : > { %p187_p1 = scmp.lt.s32.totalorder %s1747_s18, 3 }
   0x4   : > { %p188_p2 = pnand %p1398_p0, %p187_p1 }
   0x5   : > { %p1791_p3 = scmp.lt.s32.totalorder (!%p188_p2), %s1394_s19, 1  ;;  %s1750_s25 = smov (!%p188_p2), 64  }
   0x6   : > { %191 = sbr.rel (%p188_p2) target bundleno = 1007 (0x3ef), region = 40 }
   0xb   : > { %vm290_vm0 = vcmask 523264   ;;  %vm292_vm1 = vcmask 517120   ;;  %v1749_v0 = vmov 0.0   ;;  %s2337_s19 = smov (!%p1791_p3, %s1394_s19), 1  ;;  %v1703_v25 = vld [vmem:[%s2330_s1 + $0x98] sm:$0xff]   ;;  %v1751_v26 = vmov 0  }
   0xc   : > { %298 = vst.msk [vmem:[#allocation2 + $0x30] sm:$0xff] %vm290_vm0, %v1749_v0  ;;  %291 = vst.msk [vmem:[#allocation2] sm:$0xff] %vm290_vm0, %v1749_v0  ;;  %s1502_s21 = sshll.u32 %s2337_s19, 7  ;;  %598 = vmatprep.subr.bf16.mxu0 %v1751_v26  ;;  %747 = vmatprep.subr.bf16.mxu1 %v1751_v26  ;;  %v1706_v27 = vld [vmem:[%s2330_s1 + $0x38] sm:$0xff]   ;;  %v1704_v28 = vld [vmem:[%s2330_s1 + $0x90] sm:$0xff]   ;;  %vm1752_vm2 = vmmov 0  }
   0xd   : > { %299 = vst.msk [vmem:[#allocation2 + $0x38] sm:$0x3] %vm292_vm1, %v1749_v0  ;;  %293 = vst.msk [vmem:[#allocation2 + $0x8] sm:$0x3] %vm292_vm1, %v1749_v0  ;;  %s219_s24 = scalar_lea.vmem %s2329_s0, %s1502_s21  ;;  %599 = vmatpush1.bf16.msra.mxu0 %v1703_v25  ;;  %748 = vmatpush1.bf16.msra.mxu1 %v1706_v27  ;;  %v1708_v29 = vld [vmem:[%s2330_s1 + $0x30] sm:$0xff]   ;;  %v1705_v30 = vld [vmem:[%s2330_s1 + $0x88] sm:$0xff]  }
   0xe   : > { %294 = vst.msk [vmem:[#allocation2 + $0x10] sm:$0xff] %vm290_vm0, %v1749_v0  ;;  %296 = vst.msk [vmem:[#allocation2 + $0x20] sm:$0xff] %vm290_vm0, %v1749_v0  ;;  %v230_v1 = vld [vmem:[%s219_s24 + $0x20] sm:$0xff]  ;;  %v231_v2 = vld [vmem:[%s219_s24 + $0x28] sm:$0xff]  ;;  %600 = vmatprep.subr.bf16.mxu0 %v1751_v26  ;;  %749 = vmatprep.subr.bf16.mxu1 %v1751_v26  ;;  %s1503_s20 = sshll.u32 %s2337_s19, 5 }
   0xf   : > { %295 = vst.msk [vmem:[#allocation2 + $0x18] sm:$0x3] %vm292_vm1, %v1749_v0  ;;  %297 = vst.msk [vmem:[#allocation2 + $0x28] sm:$0x3] %vm292_vm1, %v1749_v0  ;;  %v226_v3 = vld [vmem:[%s219_s24] sm:$0xff]  ;;  %v1843_v4 = vmax.f32 %v230_v1, %v231_v2  ;;  %v227_v5 = vld [vmem:[%s219_s24 + $0x8] sm:$0xff]  ;;  %s224_s19 = scalar_lea.vmem %s2334_s5, %s1503_s20 }
  0x10   : > { %300 = vst.msk [vmem:[#allocation2 + $0x40] sm:$0xff] %vm290_vm0, %v1749_v0  ;;  %302 = vst.msk [vmem:[#allocation2 + $0x50] sm:$0xff] %vm290_vm0, %v1749_v0  ;;  %v232_v6 = vld [vmem:[%s219_s24 + $0x30] sm:$0xff]  ;;  %v233_v7 = vld [vmem:[%s219_s24 + $0x38] sm:$0xff]  ;;  %v1845_v8 = vmax.f32 %v226_v3, %v227_v5 }
  0x11   : > { %301 = vst.msk [vmem:[#allocation2 + $0x48] sm:$0x3] %vm292_vm1, %v1749_v0  ;;  %303 = vst.msk [vmem:[#allocation2 + $0x58] sm:$0x3] %vm292_vm1, %v1749_v0  ;;  %v228_v9 = vld [vmem:[%s219_s24 + $0x10] sm:$0xff]  ;;  %v229_v10 = vld [vmem:[%s219_s24 + $0x18] sm:$0xff]  ;;  %262 = vrot.lane.b32.xlu1 %v1843_v4, %s1750_s25  ;;  %v1849_v11 = vmax.f32 %v232_v6, %v233_v7  ;;  %601 = vmatpush1.bf16.msra.mxu0 %v1704_v28 }
  0x12   : > { %304 = vst.msk [vmem:[#allocation2 + $0x60] sm:$0xff] %vm290_vm0, %v1749_v0  ;;  %306 = vst.msk [vmem:[#allocation2 + $0x70] sm:$0xff] %vm290_vm0, %v1749_v0  ;;  %258 = vrot.lane.b32.xlu0 %v1845_v8, %s1750_s25  ;;  %v1853_v12 = vmax.f32 %v228_v9, %v229_v10  ;;  %v236_v13 = vld [vmem:[%s219_s24 + $0x50] sm:$0xff]  ;;  %v237_v14 = vld [vmem:[%s219_s24 + $0x58] sm:$0xff]  ;;  %602 = vmatprep.subr.bf16.mxu0 %v1751_v26 }
  0x13   : > { %305 = vst.msk [vmem:[#allocation2 + $0x68] sm:$0x3] %vm292_vm1, %v1749_v0  ;;  %307 = vst.msk [vmem:[#allocation2 + $0x78] sm:$0x3] %vm292_vm1, %v1749_v0  ;;  %v234_v15 = vld [vmem:[%s219_s24 + $0x40] sm:$0xff]  ;;  %v235_v16 = vld [vmem:[%s219_s24 + $0x48] sm:$0xff]  ;;  %v1857_v19 = vmax.f32 %v236_v13, %v237_v14  ;;  %750 = vmatpush1.bf16.msra.mxu1 %v1708_v29 }
  0x14   : > { %308 = vst.msk [vmem:[#allocation2 + $0x80] sm:$0xff] %vm290_vm0, %v1749_v0  ;;  %310 = vst.msk [vmem:[#allocation2 + $0x90] sm:$0xff] %vm290_vm0, %v1749_v0  ;;  %v240_v17 = vld [vmem:[%s219_s24 + $0x70] sm:$0xff]  ;;  %v241_v18 = vld [vmem:[%s219_s24 + $0x78] sm:$0xff]  ;;  %v1861_v22 = vmax.f32 %v234_v15, %v235_v16  ;;  %751 = vmatprep.subr.bf16.mxu1 %v1751_v26 }
  0x15   : > { %309 = vst.msk [vmem:[#allocation2 + $0x88] sm:$0x3] %vm292_vm1, %v1749_v0  ;;  %311 = vst.msk [vmem:[#allocation2 + $0x98] sm:$0x3] %vm292_vm1, %v1749_v0  ;;  %264 = vrot.lane.b32.xlu1 %v1849_v11, %s1750_s25  ;;  %v238_v20 = vld [vmem:[%s219_s24 + $0x60] sm:$0xff]  ;;  %v239_v21 = vld [vmem:[%s219_s24 + $0x68] sm:$0xff]  ;;  %v1865_v23 = vmax.f32 %v240_v17, %v241_v18  ;;  %603 = vmatpush1.bf16.msra.mxu0 %v1705_v30 }
  0x16   : > { %260 = vrot.lane.b32.xlu0 %v1853_v12, %s1750_s25  ;;  %v1869_v24 = vmax.f32 %v238_v20, %v239_v21  ;;  %v1710_v31 = vld [vmem:[%s2330_s1 + $0x28] sm:$0xff]   ;;  %v1707_v32 = vld [vmem:[%s2330_s1 + $0x80] sm:$0xff]   ;;  %604 = vmatprep.subr.bf16.mxu0 %v1751_v26  ;;  %v1709_v34 = vld [vmem:[%s2330_s1 + $0x78] sm:$0xff]  }
  0x17   : > { %752 = vmatpush1.bf16.msra.mxu1 %v1710_v31  ;;  %v1712_v33 = vld [vmem:[%s2330_s1 + $0x20] sm:$0xff]   ;;  %v1714_v35 = vld [vmem:[%s2330_s1 + $0x18] sm:$0xff]   ;;  %v1711_v36 = vld [vmem:[%s2330_s1 + $0x70] sm:$0xff]  }
  0x18   : > { %753 = vmatprep.subr.bf16.mxu1 %v1751_v26  ;;  %v1716_v37 = vld [vmem:[%s2330_s1 + $0x10] sm:$0xff]   ;;  %v1713_v38 = vld [vmem:[%s2330_s1 + $0x68] sm:$0xff]   ;;  %v1715_v40 = vld [vmem:[%s2330_s1 + $0x60] sm:$0xff]  }
  0x19   : > { %268 = vrot.lane.b32.xlu1 %v1857_v19, %s1750_s25  ;;  %605 = vmatpush1.bf16.msra.mxu0 %v1707_v32  ;;  %v1718_v39 = vld [vmem:[%s2330_s1 + $0x8] sm:$0xff]   ;;  %v1720_v41 = vld [vmem:[%s2330_s1] sm:$0xff]   ;;  %v1717_v42 = vld [vmem:[%s2330_s1 + $0xb8] sm:$0xff]  }
  0x1a   : > { %266 = vrot.lane.b32.xlu0 %v1861_v22, %s1750_s25  ;;  %606 = vmatprep.subr.bf16.mxu0 %v1751_v26  ;;  %v1722_v43 = vld [vmem:[%s2330_s1 + $0x58] sm:$0xff]   ;;  %v1719_v44 = vld [vmem:[%s2330_s1 + $0xb0] sm:$0xff]   ;;  %v1721_v45 = vld [vmem:[%s2330_s1 + $0xa8] sm:$0xff]  }
  0x1b   : > { %754 = vmatpush1.bf16.msra.mxu1 %v1712_v33  ;;  %v1723_v51 = vld [vmem:[%s2330_s1 + $0xa0] sm:$0xff]   ;;  %v1724_v54 = vld [vmem:[%s2330_s1 + $0x50] sm:$0xff]   ;;  %v1726_v61 = vld [vmem:[%s2330_s1 + $0x48] sm:$0xff]  }
  0x1c   : > { %755 = vmatprep.subr.bf16.mxu1 %v1751_v26  ;;  %v337_v59 = vld [vmem:[#allocation2 + $0x2] sm:$0xff]  ;;  %v828_v25 = vld [vmem:[#allocation2 + $0x91] sm:$0xff] }
  0x1d   : > { %272 = vrot.lane.b32.xlu1 %v1865_v23, %s1750_s25  ;;  %607 = vmatpush1.bf16.msra.mxu0 %v1709_v34  ;;  %v1728_v7 = vld [vmem:[%s2330_s1 + $0x40] sm:$0xff]  }
  0x1e   : > { %270 = vrot.lane.b32.xlu0 %v1869_v24, %s1750_s25  ;;  %608 = vmatprep.subr.bf16.mxu0 %v1751_v26  ;;  %v329_v17 = vld [vmem:[#allocation2 + $0x1] sm:$0xff] }
  0x1f   : > { %756 = vmatpush1.bf16.msra.mxu1 %v1714_v35 }
  0x20   : > { %757 = vmatprep.subr.bf16.mxu1 %v1751_v26 }
  0x21   : > { %609 = vmatpush1.bf16.msra.mxu0 %v1711_v36 }
  0x22   : > { %610 = vmatprep.subr.bf16.mxu0 %v1751_v26 }
  0x23   : > { %758 = vmatpush1.bf16.msra.mxu1 %v1716_v37  ;;  %v1725_v37 = vld [vmem:[%s2330_s1 + $0xf8] sm:$0xff]  }
  0x24   : > { %759 = vmatprep.subr.bf16.mxu1 %v1751_v26 }
  0x25   : > { %611 = vmatpush1.bf16.msra.mxu0 %v1713_v38 }
  0x26   : > { %612 = vmatprep.subr.bf16.mxu0 %v1751_v26 }
  0x27   : > { %760 = vmatpush1.bf16.msra.mxu1 %v1718_v39 }
  0x28   : > { %761 = vmatprep.subr.bf16.mxu1 %v1751_v26 }
  0x29   : > { %613 = vmatpush1.bf16.msra.mxu0 %v1715_v40 }
  0x2a   : > { %622 = vmatprep.subr.bf16.mxu0 %v1751_v26 }
  0x2b   : > { %762 = vmatpush1.bf16.msra.mxu1 %v1720_v41 }
  0x2c   : > { %771 = vmatprep.subr.bf16.mxu1 %v1751_v26 }
  0x2d   : > { %623 = vmatpush2.bf16.msra.mxu0 %v1717_v42 }
  0x2e   : > { %624 = vmatprep.subr.bf16.mxu0 %v1751_v26 }
  0x2f   : > { %772 = vmatpush2.bf16.msra.mxu1 %v1722_v43 }
  0x30   : > { %773 = vmatprep.subr.bf16.mxu1 %v1751_v26 }
  0x31   : > { %625 = vmatpush2.bf16.msra.mxu0 %v1719_v44  ;;  %v1727_v44 = vld [vmem:[%s2330_s1 + $0xf0] sm:$0xff]  }
  0x32   : > { %626 = vmatprep.subr.bf16.mxu0 %v1751_v26 }
  0x33   : > { %774 = vmatpush2.bf16.msra.mxu1 %v1724_v54 }
  0x34   : > { %775 = vmatprep.subr.bf16.mxu1 %v1751_v26 }
  0x35   : > { %627 = vmatpush2.bf16.msra.mxu0 %v1721_v45 }
  0x36   : > { %628 = vmatprep.subr.bf16.mxu0 %v1751_v26 }
  0x37   : > { %776 = vmatpush2.bf16.msra.mxu1 %v1726_v61 }
  0x38   : > { %777 = vmatprep.subr.bf16.mxu1 %v1751_v26 }
  0x39   : > { %629 = vmatpush2.bf16.msra.mxu0 %v1723_v51 }
  0x3a   : > { %994 = vmatprep.subr.bf16.mxu0 %v1751_v26 }
  0x3b   : > { %778 = vmatpush2.bf16.msra.mxu1 %v1728_v7 }
  0x3c   : > { %1561 = vmatprep.subr.mxu1 %v1749_v0 }
  0x83   : > { %v263_v46 = vpop.permute.xlu1 %262 }
  0x84   : > { %v284_v47 = vmax.f32 %v1843_v4, %v263_v46  ;;  %v259_v48 = vpop.permute.xlu0 %258 }
  0x85   : > { %v282_v49 = vmax.f32 %v1845_v8, %v259_v48  ;;  %v321_v48 = vld [vmem:[#allocation2] sm:$0xff] }
  0x86   : > { %315 = vst.msk [vmem:[#allocation2 + $0x31] sm:$0xff] %vm290_vm0, %v284_v47 }
  0x87   : > { %313 = vst.msk [vmem:[#allocation2 + $0x11] sm:$0xff] %vm290_vm0, %v282_v49  ;;  %v265_v50 = vpop.permute.xlu1 %264 }
  0x88   : > { %v285_v52 = vmax.f32 %v1849_v11, %v265_v50  ;;  %v261_v53 = vpop.permute.xlu0 %260 }
  0x89   : > { %v283_v55 = vmax.f32 %v1853_v12, %v261_v53 }
  0x8a   : > { %316 = vst.msk [vmem:[#allocation2 + $0x41] sm:$0xff] %vm290_vm0, %v285_v52 }
  0x8b   : > { %314 = vst.msk [vmem:[#allocation2 + $0x21] sm:$0xff] %vm290_vm0, %v283_v55  ;;  %v269_v56 = vpop.permute.xlu1 %268 }
  0x8c   : > { %v287_v57 = vmax.f32 %v1857_v19, %v269_v56  ;;  %v267_v58 = vpop.permute.xlu0 %266  ;;  %v1729_v56 = vld [vmem:[%s2330_s1 + $0xe8] sm:$0xff]  }
  0x8d   : > { %v286_v60 = vmax.f32 %v1861_v22, %v267_v58  ;;  %v427_v2 = vld [vmem:[#allocation2 + $0x31] sm:$0xff] }
  0x8e   : > { %318 = vst.msk [vmem:[#allocation2 + $0x61] sm:$0xff] %vm290_vm0, %v287_v57  ;;  %v338_v62 = vld [vmem:[#allocation2 + $0x12] sm:$0xff] }
  0x8f   : > { %317 = vst.msk [vmem:[#allocation2 + $0x51] sm:$0xff] %vm290_vm0, %v286_v60  ;;  %v273_v63 = vpop.permute.xlu1 %272  ;;  %v386_v1 = vpack.c.bf16 %v338_v62, %v337_v59  ;;  %v425_v10 = vld [vmem:[#allocation2 + $0x11] sm:$0xff] }
  0x90   : > { %v289_v3 = vmax.f32 %v1865_v23, %v273_v63  ;;  %v271_v4 = vpop.permute.xlu0 %270  ;;  %v1663_v20 = vpack.i.bf16 %v425_v10, %v329_v17  ;;  %v417_v32 = vld [vmem:[#allocation2 + $0x10] sm:$0xff] }
  0x91   : > { %v288_v5 = vmax.f32 %v1869_v24, %v271_v4  ;;  %1455 = vmatprep.mubr.msk.bf16.mxu1 %vm290_vm0, %v386_v1  ;;  %v428_v6 = vld [vmem:[#allocation2 + $0x41] sm:$0xff]  ;;  %v435_v40 = vld [vmem:[#allocation2 + $0x32] sm:$0xff] }
  0x92   : > { %320 = vst.msk [vmem:[#allocation2 + $0x81] sm:$0xff] %vm290_vm0, %v289_v3  ;;  %v1648_v8 = vpack.i.bf16 %v428_v6, %v427_v2  ;;  %v1988_v9 = vld [vmem:[#allocation2 + $0x22] sm:$0xff]  ;;  %v2022_v46 = vld [vmem:[#allocation2 + $0x30] sm:$0xff] }
  0x93   : > { %v426_v11 = vld [vmem:[#allocation2 + $0x21] sm:$0xff]  ;;  %319 = vst.msk [vmem:[#allocation2 + $0x71] sm:$0xff] %vm290_vm0, %v288_v5  ;;  %v482_v12 = vpack.c.bf16 %v1988_v9, %v338_v62  ;;  %v388_v3 = vpack.c.bf16 %v435_v40, %v1988_v9 }
  0x94   : > { %v1643_v13 = vpack.i.bf16 %v426_v11, %v425_v10  ;;  %1649 = vrot.lane.b32.xlu1 %v1648_v8, %s1750_s25  ;;  %v1673_v22 = vpack.i.bf16 %v427_v2, %v426_v11  ;;  %v2006_v33 = vld [vmem:[#allocation2 + $0x20] sm:$0xff] }
  0x95   : > { %1439 = vmatprep.mubr.msk.bf16.mxu0 %vm290_vm0, %v482_v12  ;;  %v430_v14 = vld [vmem:[#allocation2 + $0x61] sm:$0xff] }
  0x96   : > { %1644 = vrot.lane.b32.xlu0 %v1643_v13, %s1750_s25  ;;  %v429_v15 = vld [vmem:[#allocation2 + $0x51] sm:$0xff]  ;;  %v2008_v34 = vld [vmem:[#allocation2 + $0x42] sm:$0xff] }
  0x97   : > { %v1653_v16 = vpack.i.bf16 %v430_v14, %v429_v15  ;;  %v1683_v23 = vpack.i.bf16 %v429_v15, %v428_v6  ;;  %v484_v43 = vpack.c.bf16 %v2008_v34, %v435_v40  ;;  %v2024_v47 = vld [vmem:[#allocation2 + $0x40] sm:$0xff]  ;;  %v437_v57 = vld [vmem:[#allocation2 + $0x52] sm:$0xff] }
  0x98   : > { %v2030_v53 = vld [vmem:[#allocation2 + $0x62] sm:$0xff]  ;;  %v2046_v5 = vld [vmem:[#allocation2 + $0x50] sm:$0xff] }
  0x99   : > { %v432_v18 = vld [vmem:[#allocation2 + $0x81] sm:$0xff]  ;;  %v486_v61 = vpack.c.bf16 %v2030_v53, %v437_v57 }
  0x9a   : > { %1654 = vrot.lane.b32.xlu0 %v1653_v16, %s1750_s25  ;;  %v431_v19 = vld [vmem:[#allocation2 + $0x71] sm:$0xff]  ;;  %v1698_v27 = vpack.i.bf16 %v828_v25, %v432_v18  ;;  %v1730_v4 = vld [vmem:[%s2330_s1 + $0xe0] sm:$0xff]  }
  0x9b   : > { %v1658_v21 = vpack.i.bf16 %v432_v18, %v431_v19  ;;  %v1688_v24 = vpack.i.bf16 %v431_v19, %v430_v14  ;;  %v2048_v6 = vld [vmem:[#allocation2 + $0x60] sm:$0xff]  ;;  %v1731_v14 = vld [vmem:[%s2330_s1 + $0xd8] sm:$0xff]   ;;  %v423_v25 = vld [vmem:[#allocation2 + $0x70] sm:$0xff] }
  0x9c   : > { %v2058_v11 = vld [vmem:[#allocation2 + $0x82] sm:$0xff]  ;;  %v439_v15 = vld [vmem:[#allocation2 + $0x72] sm:$0xff] }
  0x9d   : > { %1659 = vrot.lane.b32.xlu1 %v1658_v21, %s1750_s25  ;;  %v488_v18 = vpack.c.bf16 %v2058_v11, %v439_v15  ;;  %v1734_v40 = vld [vmem:[%s2330_s1 + $0xc0] sm:$0xff]  }
  0x9e   : > { %1664 = vrot.lane.b32.xlu0 %v1663_v20, %s1750_s25 }
  0xa1   : > { %1669 = vrot.lane.b32.xlu1 %v1673_v22, %s1750_s25 }
  0xa2   : > { %1674 = vrot.lane.b32.xlu0 %v1673_v22, %s1750_s25 }
  0xa5   : > { %1679 = vrot.lane.b32.xlu1 %v1683_v23, %s1750_s25 }
  0xa6   : > { %1684 = vrot.lane.b32.xlu0 %v1683_v23, %s1750_s25  ;;  %v390_v23 = vpack.c.bf16 %v437_v57, %v2008_v34  ;;  %v1733_v34 = vld [vmem:[%s2330_s1 + $0xc8] sm:$0xff]  }
  0xa9   : > { %1689 = vrot.lane.b32.xlu1 %v1688_v24, %s1750_s25 }
  0xaa   : > { %1694 = vrot.lane.b32.xlu0 %v1688_v24, %s1750_s25  ;;  %v1732_v24 = vld [vmem:[%s2330_s1 + $0xd0] sm:$0xff]  }
  0xad   : > { %1699 = vrot.lane.b32.xlu1 %v1698_v27, %s1750_s25  ;;  %v2072_v27 = vld [vmem:[#allocation2 + $0x80] sm:$0xff] }
 0x106   : > { %v1650_v31 = vpop.permute.xlu1 %1649 }
 0x107   : > { %v1652_v41 = vunpack.i.h.bf16 %v1650_v31  ;;  %v1651_v42 = vunpack.i.l.bf16 %v1650_v31 }
 0x108   : > { %v1645_v28 = vpop.permute.xlu0 %1644 }
 0x109   : > { %v1647_v29 = vunpack.i.h.bf16 %v1645_v28  ;;  %v1646_v30 = vunpack.i.l.bf16 %v1645_v28  ;;  %v475_v51 = vsel %vm290_vm0, %v2022_v46, %v1651_v42  ;;  %v476_v52 = vsel %vm290_vm0, %v2024_v47, %v1652_v41 }
 0x10a   : > { %v483_v59 = vpack.c.bf16 %v476_v52, %v475_v51  ;;  %v1738_v52 = vld [vmem:[%s2330_s1 + $0x100] sm:$0xff]  }
 0x10b   : > { %v473_v35 = vsel %vm290_vm0, %v417_v32, %v1646_v30  ;;  %v474_v36 = vsel %vm290_vm0, %v2006_v33, %v1647_v29 }
 0x10c   : > { %v1655_v38 = vpop.permute.xlu0 %1654  ;;  %v481_v39 = vpack.c.bf16 %v474_v36, %v473_v35 }
 0x10d   : > { %v1657_v62 = vunpack.i.h.bf16 %v1655_v38  ;;  %v1656_v63 = vunpack.i.l.bf16 %v1655_v38 }
 0x10e   : > { %631 = vmatmul.mubr.bf16.vlgmr.msra.gmra.mxu0 %v481_v39  ;;  %v392_v39 = vpack.c.bf16 %v439_v15, %v2030_v53  ;;  %v2166_v15 = vld [vmem:[%s2333_s4 + $0x50] sm:$0xff] }
 0x10f   : > { %995 = vmatpush1.bf16.msra.mxu0 %v1725_v37  ;;  %1440 = vmatprep.mubr.msk.bf16.mxu0 %vm290_vm0, %v484_v43  ;;  %v477_v7 = vsel %vm290_vm0, %v2046_v5, %v1656_v63  ;;  %v478_v8 = vsel %vm290_vm0, %v2048_v6, %v1657_v62  ;;  %v1660_v12 = vpop.permute.xlu1 %1659  ;;  %v1735_v43 = vld [vmem:[%s2330_s1 + $0x118] sm:$0xff]  }
 0x110   : > { %v1665_v45 = vpop.permute.xlu0 %1664  ;;  %996 = vmatprep.subr.bf16.mxu0 %v1751_v26  ;;  %v485_v16 = vpack.c.bf16 %v478_v8, %v477_v7  ;;  %v1662_v19 = vunpack.i.h.bf16 %v1660_v12  ;;  %v1661_v20 = vunpack.i.l.bf16 %v1660_v12  ;;  %v2146_v12 = vld [vmem:[%s2333_s4 + $0x68] sm:$0xff] }
 0x111   : > { %v1667_v49 = vunpack.i.h.bf16 %v1665_v45  ;;  %v1666_v50 = vunpack.i.l.bf16 %v1665_v45  ;;  %v1736_v45 = vld [vmem:[%s2330_s1 + $0x110] sm:$0xff]  }
 0x112   : > { %v479_v28 = vsel %vm290_vm0, %v423_v25, %v1661_v20  ;;  %v480_v29 = vsel %vm290_vm0, %v2072_v27, %v1662_v19  ;;  %v2195_v19 = vld [vmem:[%s2333_s4 + $0x30] sm:$0xff]  ;;  %v2202_v20 = vld [vmem:[%s2333_s4 + $0x28] sm:$0xff] }
 0x113   : > { %997 = vmatpush1.bf16.msra.mxu0 %v1727_v44  ;;  %v377_v54 = vsel %vm290_vm0, %v321_v48, %v1666_v50  ;;  %v378_v55 = vsel %vm290_vm0, %v417_v32, %v1667_v49  ;;  %v487_v35 = vpack.c.bf16 %v480_v29, %v479_v28  ;;  %v1670_v48 = vpop.permute.xlu1 %1669  ;;  %v1737_v49 = vld [vmem:[%s2330_s1 + $0x108] sm:$0xff]  }
 0x114   : > { %v1675_v58 = vpop.permute.xlu0 %1674  ;;  %998 = vmatprep.subr.bf16.mxu0 %v1751_v26  ;;  %v385_v60 = vpack.c.bf16 %v378_v55, %v377_v54  ;;  %v1672_v50 = vunpack.i.h.bf16 %v1670_v48  ;;  %v1671_v51 = vunpack.i.l.bf16 %v1670_v48 }
 0x115   : > { %v1677_v1 = vunpack.i.h.bf16 %v1675_v58  ;;  %v1676_v2 = vunpack.i.l.bf16 %v1675_v58 }
 0x116   : > { %639 = vmatmul.mubr.bf16.gmra.mxu0 %v483_v59  ;;  %780 = vmatmul.mubr.bf16.vlgmr.msra.gmra.mxu1 %v385_v60  ;;  %v870_v53 = vsel %vm290_vm0, %v2022_v46, %v1672_v50  ;;  %v869_v54 = vsel %vm290_vm0, %v2006_v33, %v1671_v51 }
 0x117   : > { %999 = vmatpush1.bf16.msra.mxu0 %v1729_v56  ;;  %1441 = vmatprep.mubr.msk.bf16.mxu0 %vm290_vm0, %v486_v61  ;;  %v379_v9 = vsel %vm290_vm0, %v2006_v33, %v1676_v2  ;;  %v380_v10 = vsel %vm290_vm0, %v2022_v46, %v1677_v1  ;;  %v1680_v55 = vpop.permute.xlu1 %1679  ;;  %v877_v56 = vpack.c.bf16 %v870_v53, %v869_v54  ;;  %v836_v2 = vld [vmem:[#allocation2 + $0x92] sm:$0xff] }
 0x118   : > { %1456 = vmatprep.mubr.msk.bf16.mxu1 %vm290_vm0, %v388_v3  ;;  %1000 = vmatprep.subr.bf16.mxu0 %v1751_v26  ;;  %v1685_v13 = vpop.permute.xlu0 %1684  ;;  %v387_v17 = vpack.c.bf16 %v380_v10, %v379_v9  ;;  %v1682_v57 = vunpack.i.h.bf16 %v1680_v55  ;;  %v1681_v58 = vunpack.i.l.bf16 %v1680_v55  ;;  %v884_v7 = vpack.c.bf16 %v836_v2, %v2058_v11  ;;  %v2138_v11 = vld [vmem:[%s2333_s4 + $0x70] sm:$0xff] }
 0x119   : > { %v1687_v21 = vunpack.i.h.bf16 %v1685_v13  ;;  %v1686_v22 = vunpack.i.l.bf16 %v1685_v13  ;;  %v2152_v13 = vld [vmem:[%s2333_s4 + $0x60] sm:$0xff] }
 0x11a   : > { %v871_v59 = vsel %vm290_vm0, %v2024_v47, %v1681_v58 }
 0x11b   : > { %1001 = vmatpush1.bf16.msra.mxu0 %v1730_v4  ;;  %v381_v30 = vsel %vm290_vm0, %v2024_v47, %v1686_v22  ;;  %v382_v31 = vsel %vm290_vm0, %v2046_v5, %v1687_v21  ;;  %v1690_v60 = vpop.permute.xlu1 %1689  ;;  %v2209_v21 = vld [vmem:[%s2333_s4 + $0x20] sm:$0xff]  ;;  %v2216_v22 = vld [vmem:[%s2333_s4 + $0x18] sm:$0xff] }
 0x11c   : > { %1002 = vmatprep.subr.bf16.mxu0 %v1751_v26  ;;  %v1695_v32 = vpop.permute.xlu0 %1694  ;;  %v389_v36 = vpack.c.bf16 %v382_v31, %v381_v30  ;;  %v1692_v46 = vunpack.i.h.bf16 %v1690_v60  ;;  %v1691_v62 = vunpack.i.l.bf16 %v1690_v60 }
 0x11d   : > { %v1697_v37 = vunpack.i.h.bf16 %v1695_v32  ;;  %v1696_v38 = vunpack.i.l.bf16 %v1695_v32 }
 0x11e   : > { %647 = vmatmul.mubr.bf16.gmra.mxu0 %v485_v16  ;;  %788 = vmatmul.mubr.bf16.gmra.mxu1 %v387_v17  ;;  %v873_v33 = vsel %vm290_vm0, %v2048_v6, %v1691_v62  ;;  %v874_v63 = vsel %vm290_vm0, %v423_v25, %v1692_v46  ;;  %v2174_v16 = vld [vmem:[%s2333_s4 + $0x48] sm:$0xff]  ;;  %v2180_v17 = vld [vmem:[%s2333_s4 + $0x40] sm:$0xff] }
 0x11f   : > { %1003 = vmatpush1.bf16.msra.mxu0 %v1731_v14  ;;  %1442 = vmatprep.mubr.msk.bf16.mxu0 %vm290_vm0, %v488_v18  ;;  %v383_v41 = vsel %vm290_vm0, %v2048_v6, %v1696_v38  ;;  %v384_v42 = vsel %vm290_vm0, %v423_v25, %v1697_v37  ;;  %v1700_v1 = vpop.permute.xlu1 %1699  ;;  %v2132_v6 = vld [vmem:[%s2333_s4 + $0x78] sm:$0xff]  ;;  %v2236_v25 = vld [vmem:[%s2333_s4] sm:$0xff] }
 0x120   : > { %1457 = vmatprep.mubr.msk.bf16.mxu1 %vm290_vm0, %v390_v23  ;;  %1004 = vmatprep.subr.bf16.mxu0 %v1751_v26  ;;  %v391_v44 = vpack.c.bf16 %v384_v42, %v383_v41  ;;  %v1702_v4 = vunpack.i.h.bf16 %v1700_v1  ;;  %v1701_v47 = vunpack.i.l.bf16 %v1700_v1  ;;  %v2160_v14 = vld [vmem:[%s2333_s4 + $0x58] sm:$0xff] }
 0x121   : > { %1562 = vmatpush3.msra.mxu1 %v2132_v6  ;;  %v2188_v18 = vld [vmem:[%s2333_s4 + $0x38] sm:$0xff] }
 0x122   : > { %v875_v8 = vsel %vm290_vm0, %v2072_v27, %v1701_v47  ;;  %1563 = vmatprep.subr.mxu1 %v1749_v0 }
 0x123   : > { %1005 = vmatpush1.bf16.msra.mxu0 %v1732_v24  ;;  %1564 = vmatpush3.msra.mxu1 %v2138_v11  ;;  %v2230_v24 = vld [vmem:[%s2333_s4 + $0x8] sm:$0xff] }
 0x124   : > { %1006 = vmatprep.subr.bf16.mxu0 %v1751_v26  ;;  %1565 = vmatprep.subr.mxu1 %v1749_v0 }
 0x125   : > { %1566 = vmatpush3.msra.mxu1 %v2146_v12 }
 0x126   : > { %655 = vmatmul.mubr.bf16.gmra.mxu0 %v487_v35  ;;  %796 = vmatmul.mubr.bf16.gmra.mxu1 %v389_v36 }
 0x127   : > { %1007 = vmatpush1.bf16.msra.mxu0 %v1733_v34  ;;  %1458 = vmatprep.mubr.msk.bf16.mxu1 %vm290_vm0, %v392_v39 }
 0x128   : > { %1495 = vmatprep.mubr.msk.bf16.mxu0 %vm290_vm0, %v388_v3  ;;  %1008 = vmatprep.subr.bf16.mxu0 %v1751_v26  ;;  %v881_v3 = vpack.c.bf16 %v874_v63, %v873_v33 }
 0x129   : > { %1567 = vmatprep.subr.mxu1 %v1749_v0 }
 0x12a   : > { %1568 = vmatpush3.msra.mxu1 %v2152_v13 }
 0x12b   : > { %1009 = vmatpush1.bf16.msra.mxu0 %v1734_v40  ;;  %1569 = vmatprep.subr.mxu1 %v1749_v0 }
 0x12c   : > { %1018 = vmatprep.subr.bf16.mxu0 %v1751_v26  ;;  %1570 = vmatpush3.msra.mxu1 %v2160_v14 }
 0x12d   : > { %1571 = vmatprep.subr.mxu1 %v1749_v0 }
 0x12e   : > { %804 = vmatmul.mubr.bf16.gmra.mxu1 %v391_v44 }
 0x12f   : > { %1019 = vmatpush2.bf16.msra.mxu0 %v1735_v43  ;;  %1572 = vmatpush3.msra.mxu1 %v2166_v15 }
 0x130   : > { %1020 = vmatprep.subr.bf16.mxu0 %v1751_v26  ;;  %1573 = vmatprep.subr.mxu1 %v1749_v0 }
 0x131   : > { %1574 = vmatpush3.msra.mxu1 %v2174_v16  ;;  %1593 = vmatprep.mubr.msk.f32.mxu1 %vm1752_vm2, %v1749_v0 }
 0x132   : > { %1575 = vmatprep.subr.mxu1 %v1749_v0 }
 0x133   : > { %1021 = vmatpush2.bf16.msra.mxu0 %v1736_v45  ;;  %1576 = vmatpush3.msra.mxu1 %v2180_v17 }
 0x134   : > { %1022 = vmatprep.subr.bf16.mxu0 %v1751_v26  ;;  %1577 = vmatprep.subr.mxu1 %v1749_v0 }
 0x135   : > { %1578 = vmatpush3.msra.mxu1 %v2188_v18 }
 0x136   : > { %1579 = vmatprep.subr.mxu1 %v1749_v0 }
 0x137   : > { %1023 = vmatpush2.bf16.msra.mxu0 %v1737_v49  ;;  %1580 = vmatpush3.msra.mxu1 %v2195_v19 }
 0x138   : > { %1024 = vmatprep.subr.bf16.mxu0 %v1751_v26  ;;  %v872_v26 = vsel %vm290_vm0, %v2046_v5, %v1682_v57  ;;  %v820_v5 = vld [vmem:[#allocation2 + $0x90] sm:$0xff]  ;;  %1581 = vmatprep.subr.mxu1 %v1749_v0 }
 0x139   : > { %v879_v61 = vpack.c.bf16 %v872_v26, %v871_v59  ;;  %v876_v9 = vsel %vm290_vm0, %v820_v5, %v1702_v4  ;;  %1582 = vmatpush3.msra.mxu1 %v2202_v20 }
 0x13a   : > { %v883_v10 = vpack.c.bf16 %v876_v9, %v875_v8  ;;  %1583 = vmatprep.subr.mxu1 %v1749_v0 }
 0x13b   : > { %1025 = vmatpush2.bf16.msra.mxu0 %v1738_v52  ;;  %1584 = vmatpush3.msra.mxu1 %v2209_v21 }
 0x13c   : > { %1585 = vmatprep.subr.mxu1 %v1749_v0 }
 0x13d   : > { %1586 = vmatpush3.msra.mxu1 %v2216_v22 }
 0x13e   : > { %1027 = vmatmul.mubr.bf16.vlgmr.msra.gmra.mxu0 %v877_v56  ;;  %1587 = vmatprep.subr.mxu1 %v1749_v0 }
 0x13f   : > { %1496 = vmatprep.mubr.msk.bf16.mxu0 %vm290_vm0, %v390_v23  ;;  %v2223_v23 = vld [vmem:[%s2333_s4 + $0x10] sm:$0xff] }
 0x140   : > { %1588 = vmatpush3.msra.mxu1 %v2223_v23 }
 0x141   : > { %1589 = vmatprep.subr.mxu1 %v1749_v0 }
 0x142   : > { %1590 = vmatpush3.msra.mxu1 %v2230_v24 }
 0x143   : > { %1591 = vmatprep.subr.mxu1 %v1749_v0 }
 0x144   : > { %1592 = vmatpush3.msra.mxu1 %v2236_v25 }
 0x145   : > { %1596 = vmatprep.subr.mxu1 %v1749_v0 }
 0x146   : > { %1035 = vmatmul.mubr.bf16.gmra.mxu0 %v879_v61 }
 0x147   : > { %1497 = vmatprep.mubr.msk.bf16.mxu0 %vm290_vm0, %v392_v39 }
 0x14e   : > { %1043 = vmatmul.mubr.bf16.gmra.mxu0 %v881_v3 }
 0x14f   : > { %1498 = vmatprep.mubr.msk.bf16.mxu0 %vm290_vm0, %v884_v7 }
 0x156   : > { %1051 = vmatmul.mubr.bf16.gmra.mxu0 %v883_v10 }
 0x1ce   : > { %v632_v27 = vpop.f32.mrf.mxu0 }
 0x1d0   : > { %v634_v28 = vpop.f32.mrf.mxu0 }
 0x1d2   : > { %v635_v29 = vpop.f32.mrf.mxu0 }
 0x1d4   : > { %v637_v30 = vpop.f32.mrf.mxu0 }
 0x1d6   : > { %v640_v31 = vpop.f32.mrf.mxu0  ;;  %v781_v32 = vpop.f32.mrf.mxu1 }
 0x1d7   : > { %v782_v47 = vadd.f32 %v781_v32, %v632_v27 }
 0x1d8   : > { %v642_v34 = vpop.f32.mrf.mxu0  ;;  %v783_v35 = vpop.f32.mrf.mxu1 }
 0x1da   : > { %v643_v36 = vpop.f32.mrf.mxu0  ;;  %v784_v37 = vpop.f32.mrf.mxu1 }
 0x1db   : > { %v785_v3 = vadd.f32 %v784_v37, %v635_v29 }
 0x1dc   : > { %v645_v38 = vpop.f32.mrf.mxu0  ;;  %v786_v39 = vpop.f32.mrf.mxu1 }
 0x1de   : > { %v648_v40 = vpop.f32.mrf.mxu0  ;;  %v789_v41 = vpop.f32.mrf.mxu1 }
 0x1df   : > { %v790_v7 = vadd.f32 %v789_v41, %v640_v31 }
 0x1e0   : > { %v650_v42 = vpop.f32.mrf.mxu0  ;;  %v791_v43 = vpop.f32.mrf.mxu1 }
 0x1e2   : > { %v651_v44 = vpop.f32.mrf.mxu0  ;;  %v792_v45 = vpop.f32.mrf.mxu1 }
 0x1e3   : > { %v793_v9 = vadd.f32 %v792_v45, %v643_v36 }
 0x1e4   : > { %v653_v48 = vpop.f32.mrf.mxu0  ;;  %v794_v49 = vpop.f32.mrf.mxu1 }
 0x1e6   : > { %v656_v50 = vpop.f32.mrf.mxu0  ;;  %v797_v51 = vpop.f32.mrf.mxu1 }
 0x1e7   : > { %v798_v34 = vadd.f32 %v797_v51, %v648_v40 }
 0x1e8   : > { %v658_v52 = vpop.f32.mrf.mxu0  ;;  %v799_v53 = vpop.f32.mrf.mxu1 }
 0x1ea   : > { %v659_v54 = vpop.f32.mrf.mxu0  ;;  %v800_v55 = vpop.f32.mrf.mxu1 }
 0x1eb   : > { %v801_v29 = vadd.f32 %v800_v55, %v651_v44 }
 0x1ec   : > { %v661_v56 = vpop.f32.mrf.mxu0  ;;  %v802_v57 = vpop.f32.mrf.mxu1 }
 0x1ee   : > { %v805_v58 = vpop.f32.mrf.mxu1 }
 0x1ef   : > { %v806_v37 = vadd.f32 %v805_v58, %v656_v50 }
 0x1f0   : > { %v807_v59 = vpop.f32.mrf.mxu1 }
 0x1f2   : > { %v808_v26 = vpop.f32.mrf.mxu1 }
 0x1f3   : > { %v809_v48 = vadd.f32 %v808_v26, %v659_v54 }
 0x1f4   : > { %v810_v60 = vpop.f32.mrf.mxu1 }
 0x1fe   : > { %v1028_v61 = vpop.f32.mrf.mxu0 }
 0x1ff   : > { %v2245_v10 = vadd.f32 %v1028_v61, %v782_v47 }
 0x200   : > { %v1030_v46 = vpop.f32.mrf.mxu0 }
 0x202   : > { %v1031_v62 = vpop.f32.mrf.mxu0 }
 0x203   : > { %v2243_v5 = vadd.f32 %v1031_v62, %v785_v3 }
 0x204   : > { %v1033_v33 = vpop.f32.mrf.mxu0 }
 0x205   : > { %v1083_v35 = vadd.f32 %v2243_v5, %v2245_v10 }
 0x206   : > { %v1036_v63 = vpop.f32.mrf.mxu0 }
 0x207   : > { %v2247_v28 = vadd.f32 %v1036_v63, %v790_v7 }
 0x208   : > { %v1038_v1 = vpop.f32.mrf.mxu0 }
 0x209   : > { %v1084_v27 = vadd.f32 %v1083_v35, %v2247_v28 }
 0x20a   : > { %v1039_v2 = vpop.f32.mrf.mxu0 }
 0x20b   : > { %v2251_v38 = vadd.f32 %v1039_v2, %v793_v9 }
 0x20c   : > { %v1041_v4 = vpop.f32.mrf.mxu0 }
 0x20d   : > { %v1085_v36 = vadd.f32 %v1084_v27, %v2251_v38 }
 0x20e   : > { %v1044_v8 = vpop.f32.mrf.mxu0 }
 0x20f   : > { %v2254_v31 = vadd.f32 %v1044_v8, %v798_v34 }
 0x210   : > { %v1046_v30 = vpop.f32.mrf.mxu0 }
 0x211   : > { %v1086_v40 = vadd.f32 %v1085_v36, %v2254_v31 }
 0x212   : > { %v1047_v39 = vpop.f32.mrf.mxu0 }
 0x213   : > { %v2257_v41 = vadd.f32 %v1047_v39, %v801_v29 }
 0x214   : > { %v1049_v32 = vpop.f32.mrf.mxu0 }
 0x215   : > { %v1087_v49 = vadd.f32 %v1086_v40, %v2257_v41 }
 0x216   : > { %v1052_v42 = vpop.f32.mrf.mxu0 }
 0x217   : > { %v2260_v43 = vadd.f32 %v1052_v42, %v806_v37 }
 0x218   : > { %v1054_v45 = vpop.f32.mrf.mxu0 }
 0x219   : > { %v1088_v51 = vadd.f32 %v1087_v49, %v2260_v43 }
 0x21a   : > { %v1055_v44 = vpop.f32.mrf.mxu0 }
 0x21b   : > { %v2264_v52 = vadd.f32 %v1055_v44, %v809_v48 }
 0x21c   : > { %v1057_v53 = vpop.f32.mrf.mxu0 }
 0x21d   : > { %v1089_v50 = vadd.f32 %v1088_v51, %v2264_v52 }
 0x21f   : > { %v1090_v55 = vrot.slane %v1089_v50, 4 }
 0x221   : > { %v1091_v56 = vadd.f32 %v1090_v55, %v1089_v50 }
 0x223   : > { %v1092_v57 = vrot.slane %v1091_v56, 2 }
 0x225   : > { %v1093_v58 = vadd.f32 %v1092_v57, %v1091_v56 }
 0x227   : > { %v1094_v59 = vrot.slane %v1093_v58, 1 }
 0x229   : > { %v1095_v60 = vadd.f32 %v1094_v59, %v1093_v58 }
 0x22b   : > { %1594 = vmatmul.mubr.f32.vlgmr.msra.gmra.mxu1 %v1095_v60 }
 0x22c   : > { %1597 = vmatpush3.msra.mxu1 %v2132_v6  ;;  %1628 = vmatprep.mubr.msk.f32.mxu1 %vm1752_vm2, %v1749_v0  ;;  %v1166_v6 = vlaneseq }
 0x22d   : > { %1598 = vmatprep.subr.mxu1 %v1749_v0 }
 0x22e   : > { %1599 = vmatpush3.msra.mxu1 %v2138_v11  ;;  %v1167_v11 = vshrl.u32 %v1166_v6, 7 }
 0x22f   : > { %1600 = vmatprep.subr.mxu1 %v1749_v0 }
 0x230   : > { %1601 = vmatpush3.msra.mxu1 %v2146_v12  ;;  %v1168_v12 = vsub.s32 0, %v1167_v11 }
 0x231   : > { %1602 = vmatprep.subr.mxu1 %v1749_v0 }
 0x232   : > { %1603 = vmatpush3.msra.mxu1 %v2152_v13 }
 0x233   : > { %1604 = vmatprep.subr.mxu1 %v1749_v0 }
 0x234   : > { %1605 = vmatpush3.msra.mxu1 %v2160_v14 }
 0x235   : > { %1606 = vmatprep.subr.mxu1 %v1749_v0 }
 0x236   : > { %1607 = vmatpush3.msra.mxu1 %v2166_v15 }
 0x237   : > { %1608 = vmatprep.subr.mxu1 %v1749_v0 }
 0x238   : > { %1609 = vmatpush3.msra.mxu1 %v2174_v16 }
 0x239   : > { %1610 = vmatprep.subr.mxu1 %v1749_v0 }
 0x23a   : > { %1611 = vmatpush3.msra.mxu1 %v2180_v17 }
 0x23b   : > { %1612 = vmatprep.subr.mxu1 %v1749_v0 }
 0x23c   : > { %1613 = vmatpush3.msra.mxu1 %v2188_v18 }
 0x23d   : > { %1614 = vmatprep.subr.mxu1 %v1749_v0 }
 0x23e   : > { %1615 = vmatpush3.msra.mxu1 %v2195_v19 }
 0x23f   : > { %1616 = vmatprep.subr.mxu1 %v1749_v0 }
 0x240   : > { %1617 = vmatpush3.msra.mxu1 %v2202_v20 }
 0x241   : > { %1618 = vmatprep.subr.mxu1 %v1749_v0 }
 0x242   : > { %1619 = vmatpush3.msra.mxu1 %v2209_v21 }
 0x243   : > { %1620 = vmatprep.subr.mxu1 %v1749_v0 }
 0x244   : > { %1621 = vmatpush3.msra.mxu1 %v2216_v22 }
 0x245   : > { %1622 = vmatprep.subr.mxu1 %v1749_v0 }
 0x246   : > { %1623 = vmatpush3.msra.mxu1 %v2223_v23 }
 0x247   : > { %1624 = vmatprep.subr.mxu1 %v1749_v0 }
 0x248   : > { %1625 = vmatpush3.msra.mxu1 %v2230_v24 }
 0x249   : > { %1626 = vmatprep.subr.mxu1 %v1749_v0 }
 0x24a   : > { %1627 = vmatpush3.msra.mxu1 %v2236_v25 }
 0x2eb   : > { %v1162_v13 = vpop.f32.mrf.mxu1 }
 0x2ec   : > { %v1169_v14 = vrot.slane %v1162_v13, %v1168_v12 }
 0x2ed   : > { %v1595_v15 = vpop.f32.mrf.mxu1 }
 0x2ee   : > { %v1170_v16 = vsub.f32 %v2245_v10, %v1169_v14  ;;  %v1171_v17 = vsub.f32 %v2243_v5, %v1169_v14  ;;  %v1172_v18 = vsub.f32 %v2247_v28, %v1169_v14  ;;  %v1173_v19 = vsub.f32 %v2251_v38, %v1169_v14  ;;  %v1270_v38 = vld [vmem:[%s2331_s2] sm:$0x1] }
 0x2ef   : > { %v1174_v0 = vsub.f32 %v2254_v31, %v1169_v14  ;;  %v1175_v24 = vsub.f32 %v2257_v41, %v1169_v14  ;;  %v1176_v26 = vsub.f32 %v2260_v43, %v1169_v14  ;;  %v1177_v62 = vsub.f32 %v2264_v52, %v1169_v14  ;;  %v1499_v31 = vld [vmem:[%s2332_s3] ss:$0 sm:$0xff] }
 0x2f0   : > { %v1178_v20 = vmul.f32 %v1170_v16, %v1170_v16  ;;  %v1179_v21 = vmul.f32 %v1171_v17, %v1171_v17  ;;  %v1180_v22 = vmul.f32 %v1172_v18, %v1172_v18  ;;  %v1181_v25 = vmul.f32 %v1173_v19, %v1173_v19 }
 0x2f1   : > { %v1182_v61 = vmul.f32 %v1174_v0, %v1174_v0  ;;  %v1183_v33 = vmul.f32 %v1175_v24, %v1175_v24  ;;  %v1184_v1 = vmul.f32 %v1176_v26, %v1176_v26  ;;  %v1185_v3 = vmul.f32 %v1177_v62, %v1177_v62 }
 0x2f2   : > { %v1186_v23 = vadd.f32 %v1179_v21, %v1178_v20 }
 0x2f4   : > { %v1187_v54 = vadd.f32 %v1186_v23, %v1180_v22 }
 0x2f6   : > { %v1188_v46 = vadd.f32 %v1187_v54, %v1181_v25 }
 0x2f8   : > { %v1189_v63 = vadd.f32 %v1188_v46, %v1182_v61 }
 0x2fa   : > { %v1190_v2 = vadd.f32 %v1189_v63, %v1183_v33 }
 0x2fc   : > { %v1191_v4 = vadd.f32 %v1190_v2, %v1184_v1 }
 0x2fe   : > { %v1192_v47 = vadd.f32 %v1191_v4, %v1185_v3 }
 0x300   : > { %v1193_v7 = vrot.slane %v1192_v47, 4 }
 0x302   : > { %v1194_v5 = vadd.f32 %v1193_v7, %v1192_v47 }
 0x304   : > { %v1195_v8 = vrot.slane %v1194_v5, 2 }
 0x306   : > { %v1196_v9 = vadd.f32 %v1195_v8, %v1194_v5 }
 0x308   : > { %v1197_v10 = vrot.slane %v1196_v9, 1 }
 0x30a   : > { %v1198_v28 = vadd.f32 %v1197_v10, %v1196_v9 }
 0x30c   : > { %1629 = vmatmul.mubr.f32.vlgmr.msra.gmra.mxu1 %v1198_v28 }
 0x3cc   : > { %v1265_v30 = vpop.f32.mrf.mxu1 }
 0x3cd   : > { %v1266_v34 = vadd.f32 1e-05, %v1265_v30 }
 0x3ce   : > { %v1630_v35 = vpop.f32.mrf.mxu1 }
 0x3cf   : > { %1739 = vrsqrt.f32 %v1266_v34 }
 0x3dc   : > { %v1740_v39 = vpop.eup %1739 }
 0x3dd   : > { %v1271_v29 = vmul.f32 %v1740_v39, %v1270_v38 }
 0x3df   : > { %v1275_v27 = vrot.slane %v1271_v29, %v1168_v12 }
 0x3e1   : > { %v1276_v32 = vmul.f32 %v1275_v27, %v1170_v16  ;;  %v1277_v37 = vmul.f32 %v1275_v27, %v1171_v17  ;;  %v1278_v36 = vmul.f32 %v1275_v27, %v1172_v18  ;;  %v1279_v41 = vmul.f32 %v1275_v27, %v1173_v19 }
 0x3e2   : > { %v1280_v42 = vmul.f32 %v1275_v27, %v1174_v0  ;;  %v1281_v40 = vmul.f32 %v1275_v27, %v1175_v24  ;;  %v1282_v43 = vmul.f32 %v1275_v27, %v1176_v26  ;;  %v1283_v45 = vmul.f32 %v1275_v27, %v1177_v62 }
 0x3e3   : > { %v1291_v48 = vadd.f32 %v1499_v31, %v1276_v32  ;;  %v1292_v49 = vadd.f32 %v1499_v31, %v1277_v37  ;;  %v1293_v44 = vadd.f32 %v1499_v31, %v1278_v36  ;;  %v1294_v51 = vadd.f32 %v1499_v31, %v1279_v41 }
 0x3e4   : > { %v1295_v52 = vadd.f32 %v1499_v31, %v1280_v42  ;;  %v1296_v53 = vadd.f32 %v1499_v31, %v1281_v40  ;;  %v1297_v50 = vadd.f32 %v1499_v31, %v1282_v43  ;;  %v1298_v55 = vadd.f32 %v1499_v31, %v1283_v45 }
 0x3e5   : > { %vm1299_vm3 = vcmp.gt.f32.partialorder %v1291_v48, 0.0  ;;  %vm1300_vm4 = vcmp.gt.f32.partialorder %v1292_v49, 0.0  ;;  %vm1301_vm5 = vcmp.gt.f32.partialorder %v1293_v44, 0.0  ;;  %vm1302_vm6 = vcmp.gt.f32.partialorder %v1294_v51, 0.0 }
 0x3e6   : > { %vm1303_vm7 = vcmp.gt.f32.partialorder %v1295_v52, 0.0  ;;  %vm1304_vm8 = vcmp.gt.f32.partialorder %v1296_v53, 0.0  ;;  %vm1305_vm9 = vcmp.gt.f32.partialorder %v1297_v50, 0.0  ;;  %vm1306_vm10 = vcmp.gt.f32.partialorder %v1298_v55, 0.0 }
 0x3e7   : > { %v1307_v56 = vmul.f32 0.01, %v1291_v48  ;;  %v1308_v57 = vmul.f32 0.01, %v1292_v49  ;;  %v1309_v58 = vmul.f32 0.01, %v1293_v44 }
 0x3e8   : > { %v1310_v59 = vmul.f32 0.01, %v1294_v51  ;;  %v1311_v60 = vmul.f32 0.01, %v1295_v52  ;;  %v1312_v6 = vmul.f32 0.01, %v1296_v53 }
 0x3e9   : > { %v1313_v11 = vmul.f32 0.01, %v1297_v50  ;;  %v1314_v12 = vmul.f32 0.01, %v1298_v55  ;;  %v1315_v13 = vsel %vm1299_vm3, %v1291_v48, %v1307_v56  ;;  %v1316_v14 = vsel %vm1300_vm4, %v1292_v49, %v1308_v57 }
 0x3ea   : > { %v1317_v15 = vsel %vm1301_vm5, %v1293_v44, %v1309_v58  ;;  %v1318_v16 = vsel %vm1302_vm6, %v1294_v51, %v1310_v59  ;;  %v1319_v17 = vsel %vm1303_vm7, %v1295_v52, %v1311_v60  ;;  %v1320_v18 = vsel %vm1304_vm8, %v1296_v53, %v1312_v6 }
 0x3eb   : > { %v1321_v19 = vsel %vm1305_vm9, %v1297_v50, %v1313_v11  ;;  %v1322_v20 = vsel %vm1306_vm10, %v1298_v55, %v1314_v12  ;;  %v1507_v21 = vpack.c.bf16 %v1316_v14, %v1315_v13  ;;  %v1512_v0 = vpack.c.bf16 %v1318_v16, %v1317_v15 }
 0x3ec   : > { %v1517_v22 = vpack.c.bf16 %v1320_v18, %v1319_v17  ;;  %v1522_v23 = vpack.c.bf16 %v1322_v20, %v1321_v19 }
 0x3ed   : > { %1508 = vst [vmem:[%s224_s19] sm:$0xff] %v1507_v21   ;;  %1524 = vst [vmem:[%s224_s19 + $0x8] sm:$0xff] %v1512_v0  }
 0x3ee   : > { %1525 = vst [vmem:[%s224_s19 + $0x10] sm:$0xff] %v1517_v22   ;;  %1526 = vst [vmem:[%s224_s19 + $0x18] sm:$0xff] %v1522_v23  }
 0x3ef PF: > { %s15_s18 = sadd.s32 1, %s1747_s18  }
 0x3f0   : > { %p12_p4 = scmp.ge.s32.totalorder %s15_s18, 4  }
 0x3f2   :  { %14 = sbr.rel (!%p12_p4) target bundleno = 1 (0x1), region = 74 }

// kernel: down_forward.3
= control target key start
LH: loop header
LB: loop body
LE: loop exit
PB: predicated region body
PF: predicated region fallthrough
CT: control target
= control target key end

     0   :  { %10 = vsyncpa [#allocation4], 0  ;;  %s3058_s0 = inlined_call_operand.vmem [shape: bf16[2,8,8,128], index: 0, kind: input, shape index: {}]   ;;  %s3059_s1 = inlined_call_operand.vmem [shape: bf16[3,384,128], index: 1, kind: input, shape index: {}]   ;;  %s3060_s2 = inlined_call_operand.vmem [shape: f32[1,128], index: 2, kind: input, shape index: {}]   ;;  %s3061_s3 = inlined_call_operand.vmem [shape: f32[1,128], index: 3, kind: input, shape index: {}]   ;;  %s3062_s4 = inlined_call_operand.vmem [shape: f32[128,128], index: 4, kind: input, shape index: {}]   ;;  %s3063_s5 = inlined_call_operand.hbm [shape: f32[2,8,8,128], index: 5, kind: output, shape index: {}]  }
   0x1   :  { %12 = vsyncpa [#allocation4 + $0x1], 0  ;;  %s2449_s18 = smov 0   ;;  %s2451_s19 = smov 0  }
   0x2   :  { %s2453_s20 = smov 0   ;;  %s2455_s21 = smov 0  }
   0x3 LB: > { %s2470_s22 = sadd.s32 4294967295, %s2412_s21   ;;  %s1694_s23 = sadd.s32 4294967294, %s2412_s21   ;;  %s2412_s21 = sphi %s2455_s21, %s3077_s21   ;;  %s2408_s20 = sphi %s2453_s20, %s3076_s20   ;;  %s2404_s19 = sphi %s2451_s19, %s3075_s19   ;;  %s2400_s18 = sphi %s2449_s18, %s3074_s18  }
   0x4   : > { %s2474_s24 = sadd.s32 1, %s2412_s21   ;;  %s135_s25 = sadd.s32 1, %s2408_s20 }
   0x5   : > { %s132_s26 = ssub.s32 %s2412_s21, %s2474_s24  ;;  %p145_p0 = scmp.ne.s32.totalorder %s2408_s20, %s2404_s19 }
   0x6   : > { %p133_p1 = scmp.eq.s32.totalorder %s132_s26, 0  ;;  %p146_p2 = scmp.eq.s32.totalorder %s2470_s22, 1 }
   0x7   : > { %p151_p3 = scmp.ne.s32.totalorder %s2404_s19, %s2400_s18  ;;  %p152_p4 = scmp.eq.s32.totalorder %s1694_s23, 1 }
   0x8   : > { %s2485_s27 = scalar_select %p133_p1, %s2408_s20, %s135_s25  }
   0x9   : > { %p2487_p5 = por %p146_p2, %p145_p0  ;;  %p2491_p6 = por %p152_p4, %p151_p3 }
   0xa   : > { %p1697_p7 = scmp.ge.s32.totalorder %s2412_s21, 1  ;;  %p190_p8 = scmp.lt.s32.totalorder %s2412_s21, 3 }
   0xc   : > { %p191_p9 = pnand %p1697_p7, %p190_p8 }
   0xe   : > { %194 = sbr.rel (%p191_p9) target bundleno = 824 (0x338), region = 40 }
  0x13   : > { %v2271_v0 = vld [vmem:[%s3059_s1 + $0x138] sm:$0xff]   ;;  %v2414_v3 = vmov 0.0   ;;  %v2274_v4 = vld [vmem:[%s3059_s1 + $0x130] sm:$0xff]   ;;  %v2277_v7 = vld [vmem:[%s3059_s1 + $0x128] sm:$0xff]   ;;  %p218_p10 = scmp.lt.s32.totalorder %s2470_s22, 1  ;;  %vm2415_vm0 = vmmov 0  }
  0x14   : > { %v2272_v1 = vld [vmem:[%s3059_s1 + $0xf8] sm:$0xff]   ;;  %1896 = vmatprep.subr.bf16.mxu0 %v2271_v0  ;;  %234 = vst [vmem:[#allocation2 + $0x10] sm:$0xff] %v2414_v3  ;;  %235 = vst [vmem:[#allocation2 + $0x18] sm:$0x3] %v2414_v3  ;;  %v2275_v5 = vld [vmem:[%s3059_s1 + $0xf0] sm:$0xff]   ;;  %s1876_s30 = sshll.u32 %s2470_s22, 10 }
  0x15   : > { %v2273_v2 = vld [vmem:[%s3059_s1 + $0x178] sm:$0xff]   ;;  %236 = vst [vmem:[#allocation2 + $0x20] sm:$0xff] %v2414_v3  ;;  %237 = vst [vmem:[#allocation2 + $0x28] sm:$0x3] %v2414_v3  ;;  %1897 = vmatpush3.bf16.msra.mxu0 %v2272_v1  ;;  %v2276_v6 = vld [vmem:[%s3059_s1 + $0x170] sm:$0xff]   ;;  %s219_s17 = scalar_select %p218_p10, %s2470_s22, 1 }
  0x16   : > { %232 = vst [vmem:[#allocation2] sm:$0xff] %v2414_v3  ;;  %233 = vst [vmem:[#allocation2 + $0x8] sm:$0x3] %v2414_v3  ;;  %2086 = vmatprep.subr.bf16.mxu1 %v2273_v2  ;;  %1898 = vmatprep.subr.bf16.mxu0 %v2274_v4  ;;  %v2278_v8 = vld [vmem:[%s3059_s1 + $0xe8] sm:$0xff]   ;;  %v2280_v10 = vld [vmem:[%s3059_s1 + $0x120] sm:$0xff]   ;;  %s3006_s9 = scalar_lea.hbm %s3063_s5, %s1876_s30  ;;  %s2416_s12 = smov [#allocation3]  }
  0x17   : > { %238 = vst [vmem:[#allocation2 + $0x30] sm:$0xff] %v2414_v3  ;;  %239 = vst [vmem:[#allocation2 + $0x38] sm:$0x3] %v2414_v3  ;;  %2087 = vmatpush3.bf16.msra.mxu1 %v2273_v2  ;;  %v2279_v9 = vld [vmem:[%s3059_s1 + $0x168] sm:$0xff]   ;;  %v2281_v11 = vld [vmem:[%s3059_s1 + $0xe0] sm:$0xff]   ;;  %s1875_s8 = sshll.u32 %s219_s17, 5 }
  0x18   : > { %240 = vst [vmem:[#allocation2 + $0x40] sm:$0xff] %v2414_v3  ;;  %241 = vst [vmem:[#allocation2 + $0x48] sm:$0x3] %v2414_v3  ;;  %2088 = vmatprep.subr.bf16.mxu1 %v2276_v6  ;;  %v2282_v12 = vld [vmem:[%s3059_s1 + $0x160] sm:$0xff]   ;;  %v2283_v13 = vld [vmem:[%s3059_s1 + $0x118] sm:$0xff]   ;;  %s2582_s23 = scalar_lea.vmem %s3058_s0, %s1875_s8  ;;  %s215_s17 = sand.u32 1, %s2404_s19  }
  0x19   : > { %242 = vst [vmem:[#allocation2 + $0x50] sm:$0xff] %v2414_v3  ;;  %243 = vst [vmem:[#allocation2 + $0x58] sm:$0x3] %v2414_v3  ;;  %1899 = vmatpush3.bf16.msra.mxu0 %v2275_v5  ;;  %v2285_v14 = vld [vmem:[%s3059_s1 + $0x158] sm:$0xff]   ;;  %v2286_v16 = vld [vmem:[%s3059_s1 + $0x110] sm:$0xff]   ;;  %s1698_s25 = sshll.u32 %s215_s17, 6 }
  0x1a   : > { %244 = vst [vmem:[#allocation2 + $0x60] sm:$0xff] %v2414_v3  ;;  %245 = vst [vmem:[#allocation2 + $0x68] sm:$0x3] %v2414_v3  ;;  %1900 = vmatprep.subr.bf16.mxu0 %v2277_v7  ;;  %v2284_v15 = vld [vmem:[%s3059_s1 + $0xd8] sm:$0xff]   ;;  %v2288_v17 = vld [vmem:[%s3059_s1 + $0x150] sm:$0xff]   ;;  %s217_s6 = scalar_lea.vmem [#allocation3], %s1698_s25 }
  0x1b   : > { %246 = vst [vmem:[#allocation2 + $0x70] sm:$0xff] %v2414_v3  ;;  %247 = vst [vmem:[#allocation2 + $0x78] sm:$0x3] %v2414_v3  ;;  %2089 = vmatpush3.bf16.msra.mxu1 %v2276_v6  ;;  %v2287_v18 = vld [vmem:[%s3059_s1 + $0xd0] sm:$0xff]   ;;  %v2289_v19 = vld [vmem:[%s3059_s1 + $0x108] sm:$0xff]   ;;  %s1632_s7 = sshll.u32 %s217_s6, 4  ;;  %s3008_s7 = int_to_ptr.vmem [resolvable:$true] %s1632_s7 }
  0x1c   : > { %248 = vst [vmem:[#allocation2 + $0x80] sm:$0xff] %v2414_v3  ;;  %249 = vst [vmem:[#allocation2 + $0x88] sm:$0x3] %v2414_v3  ;;  %2090 = vmatprep.subr.bf16.mxu1 %v2279_v9  ;;  %v2290_v20 = vld [vmem:[%s3059_s1 + $0xc8] sm:$0xff]   ;;  %v2292_v22 = vld [vmem:[%s3059_s1 + $0x100] sm:$0xff]   ;;  %s3018_s10 = scalar_lea.sflag [#allocation4], %s215_s17 }
  0x1d   : > { %250 = vst [vmem:[#allocation2 + $0x90] sm:$0xff] %v2414_v3  ;;  %251 = vst [vmem:[#allocation2 + $0x98] sm:$0x3] %v2414_v3  ;;  %1901 = vmatpush3.bf16.msra.mxu0 %v2278_v8  ;;  %v2291_v21 = vld [vmem:[%s3059_s1 + $0x148] sm:$0xff]   ;;  %v2591_v23 = vld [vmem:[%s2582_s23] sm:$0xff]   ;;  %s2352_s11 = scalar_lea.vmem %s3008_s7, 1024 }
  0x1e   : > { %1902 = vmatprep.subr.bf16.mxu0 %v2280_v10  ;;  %v2295_v24 = vld [vmem:[%s2582_s23] sm:$0xff]  ;;  %v1879_v25 = vunpack.c.l.bf16 %v2591_v23  ;;  %v1880_v26 = vunpack.c.h.bf16 %v2591_v23  ;;  %v1893_v28 = vld [vmem:[%s2582_s23 + $0x8] sm:$0xff]   ;;  %v2296_v32 = vld [vmem:[%s3059_s1 + $0x78] sm:$0xff]   ;;  %p2353_p11 = scmp.ne.s32.totalorder %s3008_s7, %s2352_s11  ;;  %s2356_s13 = sshll.u32 %s2416_s12, 4  ;;  %s2357_s13 = int_to_ptr.vmem [resolvable:$false] %s2356_s13 }
  0x1f   : > { %2091 = vmatpush3.bf16.msra.mxu1 %v2279_v9  ;;  %v2294_v27 = vld [vmem:[%s3059_s1 + $0x140] sm:$0xff]   ;;  %614 = vmatprep.mubr.bf16.mxu0 %v2295_v24  ;;  %v1883_v30 = vunpack.c.l.bf16 %v1893_v28  ;;  %v1884_v31 = vunpack.c.h.bf16 %v1893_v28  ;;  %v2298_v33 = vld [vmem:[%s3059_s1 + $0xb8] sm:$0xff]   ;;  %v2299_v40 = vld [vmem:[%s3059_s1 + $0x70] sm:$0xff]   ;;  %s2358_s14 = scalar_lea.vmem %s2357_s13, 2048  ;;  %p2359_p0 = scmp.lt.s32.totalorder %s3008_s7, %s2357_s13 }
  0x20   : > { %2092 = vmatprep.subr.bf16.mxu1 %v2282_v12  ;;  %v2293_v29 = vld [vmem:[%s3059_s1 + $0xc0] sm:$0xff]   ;;  %261 = vst [vmem:[#allocation2 + $0x11] sm:$0xff] %v1879_v25  ;;  %262 = vst [vmem:[#allocation2 + $0x21] sm:$0xff] %v1880_v26  ;;  %v2297_v34 = vld [vmem:[%s3059_s1 + $0x38] sm:$0xff]   ;;  %p2354_p12 = pnand %p2353_p11, %p2487_p5  ;;  %p2360_p1 = scmp.lt.s32.totalorder %s2358_s14, %s2352_s11 }
  0x21   : > { %1903 = vmatpush3.bf16.msra.mxu0 %v2281_v11  ;;  %263 = vst [vmem:[#allocation2 + $0x31] sm:$0xff] %v1883_v30  ;;  %264 = vst [vmem:[#allocation2 + $0x41] sm:$0xff] %v1884_v31  ;;  %v2300_v44 = vld [vmem:[%s3059_s1 + $0x30] sm:$0xff]   ;;  %v2302_v45 = vld [vmem:[%s2582_s23 + $0x8] sm:$0xff] }
  0x22   : > { %1904 = vmatprep.subr.bf16.mxu0 %v2283_v13  ;;  %v2301_v47 = vld [vmem:[%s3059_s1 + $0xb0] sm:$0xff]   ;;  %v2303_v50 = vld [vmem:[%s3059_s1 + $0x68] sm:$0xff]   ;;  %v2660_v58 = vld [vmem:[%s2582_s23 + $0x18] sm:$0xff]   ;;  %p2355_p13 = pneg %p2354_p12  ;;  %p2361_p2 = por %p2360_p1, %p2359_p0 }
  0x23   : > { %2093 = vmatpush3.bf16.msra.mxu1 %v2282_v12  ;;  %v2304_v51 = vld [vmem:[%s3059_s1 + $0x28] sm:$0xff]   ;;  %v1894_v52 = vld [vmem:[%s2582_s23 + $0x10] sm:$0xff]   ;;  %v2306_v59 = vld [vmem:[%s3059_s1 + $0x60] sm:$0xff]   ;;  %v1891_v60 = vunpack.c.l.bf16 %v2660_v58  ;;  %v1892_v61 = vunpack.c.h.bf16 %v2660_v58 }
  0x24   : > { %2094 = vmatprep.subr.bf16.mxu1 %v2285_v14  ;;  %v2305_v54 = vld [vmem:[%s3059_s1 + $0xa8] sm:$0xff]   ;;  %v1887_v55 = vunpack.c.l.bf16 %v1894_v52  ;;  %v1888_v56 = vunpack.c.h.bf16 %v1894_v52  ;;  %v2309_v57 = vld [vmem:[%s2582_s23 + $0x10] sm:$0xff]  ;;  %v2308_v62 = vld [vmem:[%s3059_s1 + $0xa0] sm:$0xff]   ;;  %p2362_p3 = pnand %p2361_p2, %p2355_p13 }
  0x25   : > { %1905 = vmatpush3.bf16.msra.mxu0 %v2284_v15  ;;  %267 = vst [vmem:[#allocation2 + $0x71] sm:$0xff] %v1891_v60  ;;  %268 = vst [vmem:[#allocation2 + $0x81] sm:$0xff] %v1892_v61  ;;  %v2307_v63 = vld [vmem:[%s3059_s1 + $0x20] sm:$0xff]   ;;  %v2310_v0 = vld [vmem:[%s3059_s1 + $0x58] sm:$0xff]  }
  0x26   : > { %1906 = vmatprep.subr.bf16.mxu0 %v2286_v16  ;;  %265 = vst [vmem:[#allocation2 + $0x51] sm:$0xff] %v1887_v55  ;;  %266 = vst [vmem:[#allocation2 + $0x61] sm:$0xff] %v1888_v56  ;;  %v2311_v1 = vld [vmem:[%s3059_s1 + $0x18] sm:$0xff]   ;;  %v2313_v9 = vld [vmem:[%s3059_s1 + $0x50] sm:$0xff]  }
  0x27   : > { %2095 = vmatpush3.bf16.msra.mxu1 %v2285_v14  ;;  %v2614_v35 = vld [vmem:[#allocation2 + $0x10] sm:$0xff]  ;;  %v2616_v36 = vld [vmem:[#allocation2 + $0x20] sm:$0xff]  ;;  %v2312_v2 = vld [vmem:[%s3059_s1 + $0x98] sm:$0xff]  }
  0x28   : > { %2096 = vmatprep.subr.bf16.mxu1 %v2288_v17  ;;  %v2618_v37 = vld [vmem:[#allocation2 + $0x12] sm:$0xff]  ;;  %v377_v38 = vpack.c.bf16 %v2616_v36, %v2614_v35  ;;  %v2622_v39 = vld [vmem:[#allocation2 + $0x22] sm:$0xff] }
  0x29   : > { %1907 = vmatpush3.bf16.msra.mxu0 %v2287_v18  ;;  %v379_v41 = vpack.c.bf16 %v2622_v39, %v2618_v37  ;;  %v2629_v42 = vld [vmem:[#allocation2 + $0x32] sm:$0xff]  ;;  %v2631_v43 = vld [vmem:[#allocation2 + $0x42] sm:$0xff] }
  0x2a   : > { %1908 = vmatprep.subr.bf16.mxu0 %v2289_v19  ;;  %v382_v46 = vpack.c.bf16 %v2631_v43, %v2629_v42  ;;  %v2642_v48 = vld [vmem:[#allocation2 + $0x30] sm:$0xff]  ;;  %v2644_v49 = vld [vmem:[#allocation2 + $0x40] sm:$0xff]  ;;  %v2316_v14 = vld [vmem:[%s2582_s23 + $0x18] sm:$0xff] }
  0x2b   : > { %2097 = vmatpush3.bf16.msra.mxu1 %v2288_v17  ;;  %2102 = vmatprep.mubr.bf16.mxu1 %v379_v41  ;;  %v380_v53 = vpack.c.bf16 %v2644_v49, %v2642_v48  ;;  %v2314_v13 = vld [vmem:[%s3059_s1 + $0x10] sm:$0xff]   ;;  %v2317_v19 = vld [vmem:[%s3059_s1 + $0x48] sm:$0xff]   ;;  %v2320_v28 = vld [vmem:[%s3059_s1 + $0x40] sm:$0xff]  }
  0x2c   : > { %2098 = vmatprep.subr.bf16.mxu1 %v2291_v21  ;;  %v2696_v11 = vld [vmem:[#allocation2 + $0x72] sm:$0xff]  ;;  %v2698_v12 = vld [vmem:[#allocation2 + $0x82] sm:$0xff] }
  0x2d   : > { %1909 = vmatpush3.bf16.msra.mxu0 %v2290_v20  ;;  %v2684_v4 = vld [vmem:[#allocation2 + $0x50] sm:$0xff]  ;;  %v2686_v5 = vld [vmem:[#allocation2 + $0x60] sm:$0xff]  ;;  %v388_v15 = vpack.c.bf16 %v2698_v12, %v2696_v11  ;;  %v2318_v24 = vld [vmem:[%s3059_s1 + $0x8] sm:$0xff]  }
  0x2e   : > { %1910 = vmatprep.subr.bf16.mxu0 %v2292_v22  ;;  %v373_v6 = vld [vmem:[#allocation2 + $0x52] sm:$0xff]  ;;  %v383_v7 = vpack.c.bf16 %v2686_v5, %v2684_v4  ;;  %v2690_v8 = vld [vmem:[#allocation2 + $0x62] sm:$0xff] }
  0x2f   : > { %2099 = vmatpush3.bf16.msra.mxu1 %v2291_v21  ;;  %v385_v10 = vpack.c.bf16 %v2690_v8, %v373_v6  ;;  %v2315_v16 = vld [vmem:[%s3059_s1 + $0x90] sm:$0xff]   ;;  %v2711_v18 = vld [vmem:[#allocation2 + $0x80] sm:$0xff]  ;;  %v2319_v22 = vld [vmem:[%s3059_s1 + $0x88] sm:$0xff]  }
  0x30   : > { %2100 = vmatprep.subr.bf16.mxu1 %v2294_v27  ;;  %v2709_v17 = vld [vmem:[#allocation2 + $0x70] sm:$0xff]  ;;  %v277_v20 = vld [vmem:[#allocation2 + $0x1] sm:$0xff]  ;;  %v2324_v31 = vld [vmem:[%s3059_s1 + $0x1b8] sm:$0xff]  }
  0x31   : > { %1911 = vmatpush3.bf16.msra.mxu0 %v2293_v29  ;;  %v386_v21 = vpack.c.bf16 %v2711_v18, %v2709_v17  ;;  %v294_v26 = vpack.c.bf16 %v1879_v25, %v277_v20  ;;  %v2322_v30 = vld [vmem:[%s3059_s1 + $0x80] sm:$0xff]   ;;  %v2323_v25 = vld [vmem:[%s3059_s1 + $0x1f8] sm:$0xff]   ;;  %v2330_v41 = vld [vmem:[%s3059_s1 + $0x1e8] sm:$0xff]  }
  0x32   : > { %1948 = vmatprep.subr.bf16.mxu0 %v2296_v32  ;;  %v2321_v23 = vld [vmem:[%s3059_s1] sm:$0xff]   ;;  %v293_v32 = vpack.c.bf16 %v2614_v35, %v2414_v3  ;;  %v2328_v35 = vld [vmem:[%s3059_s1 + $0x230] sm:$0xff]   ;;  %v2339_v52 = vld [vmem:[%s3059_s1 + $0x218] sm:$0xff]  }
  0x33   : > { %2101 = vmatpush3.bf16.msra.mxu1 %v2294_v27  ;;  %v285_v27 = vld [vmem:[#allocation2 + $0x2] sm:$0xff]  ;;  %v2340_v55 = vld [vmem:[%s3059_s1 + $0x1d0] sm:$0xff]  }
  0x34   : > { %2110 = vmatprep.subr.bf16.mxu1 %v2298_v33  ;;  %615 = vmatmul.mubr.bf16.vlgmr.msra.gmra.mxu0 %v377_v38  ;;  %v295_v29 = vpack.c.bf16 %v2618_v37, %v285_v27  ;;  %v298_v37 = vpack.c.bf16 %v2629_v42, %v2622_v39  ;;  %v2326_v38 = vld [vmem:[%s3059_s1 + $0x1f0] sm:$0xff]   ;;  %v2331_v42 = vld [vmem:[%s3059_s1 + $0x1a8] sm:$0xff]  }
  0x35   : > { %1949 = vmatpush3.bf16.msra.mxu0 %v2297_v34  ;;  %622 = vmatprep.mubr.bf16.mxu0 %v2302_v45  ;;  %v2748_v34 = vld [vmem:[%s2582_s23 + $0x4] ss:$4 sps:$4 sm:$0xff]   ;;  %v2327_v39 = vld [vmem:[%s3059_s1 + $0x1b0] sm:$0xff]  }
  0x36   : > { %2103 = vmatmul.mubr.bf16.vlgmr.msra.gmra.mxu1 %v382_v46  ;;  %1950 = vmatprep.subr.bf16.mxu0 %v2299_v40  ;;  %v2756_v40 = vpack.c.bf16 %v373_v6, %v2631_v43  ;;  %v296_v43 = vpack.c.bf16 %v2642_v48, %v2616_v36  ;;  %v2336_v45 = vld [vmem:[%s2582_s23 + $0xc] ss:$4 sps:$4 sm:$0xff]   ;;  %v2333_v46 = vld [vmem:[%s3059_s1 + $0x1e0] sm:$0xff]  }
  0x37   : > { %2111 = vmatpush3.bf16.msra.mxu1 %v2298_v33  ;;  %2106 = vmatprep.mubr.bf16.mxu1 %v385_v10  ;;  %v2325_v33 = vld [vmem:[%s3059_s1 + $0x238] sm:$0xff]   ;;  %v2335_v36 = vld [vmem:[%s3059_s1 + $0x220] sm:$0xff]   ;;  %v2341_v56 = vld [vmem:[%s3059_s1 + $0x190] sm:$0xff]  }
  0x38   : > { %2112 = vmatprep.subr.bf16.mxu1 %v2301_v47  ;;  %v2334_v48 = vld [vmem:[%s3059_s1 + $0x1a0] sm:$0xff]   ;;  %v2346_v60 = vld [vmem:[%s3059_s1 + $0x208] sm:$0xff]   ;;  %v1365_v10 = vld [vmem:[%s3062_s4 + $0x58] sm:$0xff] }
  0x39   : > { %1951 = vmatpush3.bf16.msra.mxu0 %v2300_v44  ;;  %v2332_v44 = vld [vmem:[%s3059_s1 + $0x228] sm:$0xff]  }
  0x3a   : > { %1952 = vmatprep.subr.bf16.mxu0 %v2303_v50  ;;  %v2337_v50 = vld [vmem:[%s3059_s1 + $0x1d8] sm:$0xff]   ;;  %v1367_v58 = vld [vmem:[%s3062_s4 + $0x68] sm:$0xff] }
  0x3b   : > { %2113 = vmatpush3.bf16.msra.mxu1 %v2301_v47  ;;  %v304_v47 = vpack.c.bf16 %v2696_v11, %v2690_v8  ;;  %v1369_v8 = vld [vmem:[%s3062_s4 + $0x78] sm:$0xff]  ;;  %v1364_v11 = vld [vmem:[%s3062_s4 + $0x50] sm:$0xff]  ;;  %v1355_v20 = vld [vmem:[%s3062_s4 + $0x8] sm:$0xff] }
  0x3c   : > { %623 = vmatmul.mubr.bf16.gmra.mxu0 %v380_v53  ;;  %2114 = vmatprep.subr.bf16.mxu1 %v2305_v54  ;;  %v2338_v53 = vld [vmem:[%s3059_s1 + $0x198] sm:$0xff]  }
  0x3d   : > { %1953 = vmatpush3.bf16.msra.mxu0 %v2304_v51  ;;  %630 = vmatprep.mubr.bf16.mxu0 %v2309_v57  ;;  %v299_v51 = vpack.c.bf16 %v2684_v4, %v2644_v49  ;;  %v2342_v49 = vld [vmem:[%s3059_s1 + $0x210] sm:$0xff]   ;;  %v2344_v57 = vld [vmem:[%s3059_s1 + $0x1c8] sm:$0xff]  }
  0x3e   : > { %1954 = vmatprep.subr.bf16.mxu0 %v2306_v59  ;;  %2107 = vmatmul.mubr.bf16.gmra.mxu1 %v388_v15  ;;  %v302_v59 = vpack.c.bf16 %v2709_v17, %v2686_v5  ;;  %v1002_v5 = vld [vmem:[#allocation2 + $0x91] sm:$0xff]  ;;  %v1358_v17 = vld [vmem:[%s3062_s4 + $0x20] sm:$0xff] }
  0x3f   : > { %2115 = vmatpush3.bf16.msra.mxu1 %v2305_v54  ;;  %2126 = vmatprep.mubr.bf16.mxu1 %v295_v29  ;;  %v2343_v54 = vld [vmem:[%s2582_s23 + $0x14] ss:$4 sps:$4 sm:$0xff]   ;;  %v1021_v6 = vpack.c.bf16 %v1002_v5, %v1892_v61  ;;  %v1366_v61 = vld [vmem:[%s3062_s4 + $0x60] sm:$0xff] }
  0x40   : > { %2116 = vmatprep.subr.bf16.mxu1 %v2308_v62  ;;  %v1360_v15 = vld [vmem:[%s3062_s4 + $0x30] sm:$0xff] }
  0x41   : > { %1955 = vmatpush3.bf16.msra.mxu0 %v2307_v63  ;;  %v2347_v63 = vld [vmem:[%s3059_s1 + $0x1c0] sm:$0xff]  }
  0x42   : > { %1956 = vmatprep.subr.bf16.mxu0 %v2310_v0  ;;  %v2349_v0 = vld [vmem:[%s3059_s1 + $0x200] sm:$0xff]  }
  0x43   : > { %2117 = vmatpush3.bf16.msra.mxu1 %v2308_v62  ;;  %v2345_v62 = vld [vmem:[%s3059_s1 + $0x188] sm:$0xff]  }
  0x44   : > { %631 = vmatmul.mubr.bf16.gmra.mxu0 %v383_v7  ;;  %2118 = vmatprep.subr.bf16.mxu1 %v2312_v2  ;;  %v1020_v7 = vpack.c.bf16 %v2414_v3, %v2711_v18  ;;  %v1357_v18 = vld [vmem:[%s3062_s4 + $0x18] sm:$0xff] }
  0x45   : > { %1957 = vmatpush3.bf16.msra.mxu0 %v2311_v1  ;;  %638 = vmatprep.mubr.bf16.mxu0 %v2316_v14  ;;  %v2348_v1 = vld [vmem:[%s3059_s1 + $0x180] sm:$0xff]   ;;  %v1361_v14 = vld [vmem:[%s3062_s4 + $0x38] sm:$0xff] }
  0x46   : > { %1958 = vmatprep.subr.bf16.mxu0 %v2313_v9  ;;  %v1368_v9 = vld [vmem:[%s3062_s4 + $0x70] sm:$0xff] }
  0x47   : > { %2119 = vmatpush3.bf16.msra.mxu1 %v2312_v2  ;;  %v1010_v2 = vld [vmem:[#allocation2 + $0x92] sm:$0xff] }
  0x48   : > { %2120 = vmatprep.subr.bf16.mxu1 %v2315_v16  ;;  %v1022_v4 = vpack.c.bf16 %v1010_v2, %v2698_v12  ;;  %v1363_v12 = vld [vmem:[%s3062_s4 + $0x48] sm:$0xff] }
  0x49   : > { %1959 = vmatpush3.bf16.msra.mxu0 %v2314_v13  ;;  %v1362_v13 = vld [vmem:[%s3062_s4 + $0x40] sm:$0xff] }
  0x4a   : > { %1960 = vmatprep.subr.bf16.mxu0 %v2317_v19  ;;  %v1356_v19 = vld [vmem:[%s3062_s4 + $0x10] sm:$0xff] }
  0x4b   : > { %2121 = vmatpush3.bf16.msra.mxu1 %v2315_v16  ;;  %v1359_v16 = vld [vmem:[%s3062_s4 + $0x28] sm:$0xff] }
  0x4c   : > { %639 = vmatmul.mubr.bf16.gmra.mxu0 %v386_v21  ;;  %2122 = vmatprep.subr.bf16.mxu1 %v2319_v22  ;;  %v1354_v21 = vld [vmem:[%s3062_s4] sm:$0xff] }
  0x4d   : > { %1961 = vmatpush3.bf16.msra.mxu0 %v2318_v24  ;;  %888 = vmatprep.mubr.bf16.mxu0 %v294_v26 }
  0x4e   : > { %1962 = vmatprep.subr.bf16.mxu0 %v2320_v28 }
  0x4f   : > { %2123 = vmatpush3.bf16.msra.mxu1 %v2319_v22 }
  0x50   : > { %2124 = vmatprep.subr.bf16.mxu1 %v2322_v30 }
  0x51   : > { %1963 = vmatpush3.bf16.msra.mxu0 %v2321_v23 }
  0x52   : > { %2000 = vmatprep.subr.bf16.mxu0 %v2323_v25 }
  0x53   : > { %2125 = vmatpush3.bf16.msra.mxu1 %v2322_v30 }
  0x54   : > { %889 = vmatmul.mubr.bf16.vlgmr.msra.gmra.mxu0 %v293_v32  ;;  %2134 = vmatprep.subr.bf16.mxu1 %v2325_v33 }
  0x55   : > { %2001 = vmatpush3.bf16.msra.mxu0 %v2324_v31  ;;  %896 = vmatprep.mubr.bf16.mxu0 %v2748_v34 }
  0x56   : > { %2127 = vmatmul.mubr.bf16.vlgmr.msra.gmra.mxu1 %v298_v37  ;;  %2002 = vmatprep.subr.bf16.mxu0 %v2326_v38 }
  0x57   : > { %2135 = vmatpush3.bf16.msra.mxu1 %v2325_v33  ;;  %2130 = vmatprep.mubr.bf16.mxu1 %v2756_v40 }
  0x58   : > { %2136 = vmatprep.subr.bf16.mxu1 %v2328_v35 }
  0x59   : > { %2003 = vmatpush3.bf16.msra.mxu0 %v2327_v39 }
  0x5a   : > { %2004 = vmatprep.subr.bf16.mxu0 %v2330_v41 }
  0x5b   : > { %2137 = vmatpush3.bf16.msra.mxu1 %v2328_v35 }
  0x5c   : > { %897 = vmatmul.mubr.bf16.gmra.mxu0 %v296_v43  ;;  %2138 = vmatprep.subr.bf16.mxu1 %v2332_v44 }
  0x5d   : > { %2005 = vmatpush3.bf16.msra.mxu0 %v2331_v42  ;;  %904 = vmatprep.mubr.bf16.mxu0 %v2336_v45 }
  0x5e   : > { %2006 = vmatprep.subr.bf16.mxu0 %v2333_v46  ;;  %2131 = vmatmul.mubr.bf16.gmra.mxu1 %v304_v47 }
  0x5f   : > { %2139 = vmatpush3.bf16.msra.mxu1 %v2332_v44  ;;  %2150 = vmatprep.mubr.bf16.mxu1 %v298_v37 }
  0x60   : > { %2140 = vmatprep.subr.bf16.mxu1 %v2335_v36 }
  0x61   : > { %2007 = vmatpush3.bf16.msra.mxu0 %v2334_v48 }
  0x62   : > { %2008 = vmatprep.subr.bf16.mxu0 %v2337_v50 }
  0x63   : > { %2141 = vmatpush3.bf16.msra.mxu1 %v2335_v36 }
  0x64   : > { %905 = vmatmul.mubr.bf16.gmra.mxu0 %v299_v51  ;;  %2142 = vmatprep.subr.bf16.mxu1 %v2339_v52 }
  0x65   : > { %2009 = vmatpush3.bf16.msra.mxu0 %v2338_v53  ;;  %912 = vmatprep.mubr.bf16.mxu0 %v2343_v54 }
  0x66   : > { %2010 = vmatprep.subr.bf16.mxu0 %v2340_v55 }
  0x67   : > { %2143 = vmatpush3.bf16.msra.mxu1 %v2339_v52 }
  0x68   : > { %2144 = vmatprep.subr.bf16.mxu1 %v2342_v49 }
  0x69   : > { %2011 = vmatpush3.bf16.msra.mxu0 %v2341_v56 }
  0x6a   : > { %2012 = vmatprep.subr.bf16.mxu0 %v2344_v57 }
  0x6b   : > { %2145 = vmatpush3.bf16.msra.mxu1 %v2342_v49 }
  0x6c   : > { %913 = vmatmul.mubr.bf16.gmra.mxu0 %v302_v59  ;;  %2146 = vmatprep.subr.bf16.mxu1 %v2346_v60 }
  0x6d   : > { %2013 = vmatpush3.bf16.msra.mxu0 %v2345_v62  ;;  %1248 = vmatprep.mubr.bf16.mxu0 %v2748_v34 }
  0x6e   : > { %2014 = vmatprep.subr.bf16.mxu0 %v2347_v63 }
  0x6f   : > { %2147 = vmatpush3.bf16.msra.mxu1 %v2346_v60 }
  0x70   : > { %2148 = vmatprep.subr.bf16.mxu1 %v2349_v0 }
  0x71   : > { %2015 = vmatpush3.bf16.msra.mxu0 %v2348_v1 }
  0x72   : > { %2158 = vmatprep.subr.mxu0 %v2414_v3 }
  0x73   : > { %2149 = vmatpush3.bf16.msra.mxu1 %v2349_v0 }
  0x74   : > { %1249 = vmatmul.mubr.bf16.vlgmr.msra.gmra.mxu0 %v296_v43  ;;  %2193 = vmatprep.subr.mxu1 %v2414_v3 }
  0x75   : > { %1256 = vmatprep.mubr.bf16.mxu0 %v2336_v45  ;;  %2159 = vmatpush3.msra.mxu0 %v1369_v8 }
  0x76   : > { %2151 = vmatmul.mubr.bf16.vlgmr.msra.gmra.mxu1 %v2756_v40  ;;  %2160 = vmatprep.subr.mxu0 %v2414_v3 }
  0x77   : > { %2154 = vmatprep.mubr.bf16.mxu1 %v304_v47  ;;  %2194 = vmatpush3.msra.mxu1 %v1369_v8 }
  0x78   : > { %2195 = vmatprep.subr.mxu1 %v2414_v3  ;;  %2161 = vmatpush3.msra.mxu0 %v1368_v9 }
  0x79   : > { %2196 = vmatpush3.msra.mxu1 %v1368_v9  ;;  %2162 = vmatprep.subr.mxu0 %v2414_v3 }
  0x7a   : > { %2197 = vmatprep.subr.mxu1 %v2414_v3  ;;  %2163 = vmatpush3.msra.mxu0 %v1367_v58 }
  0x7b   : > { %2198 = vmatpush3.msra.mxu1 %v1367_v58  ;;  %2164 = vmatprep.subr.mxu0 %v2414_v3 }
  0x7c   : > { %1257 = vmatmul.mubr.bf16.gmra.mxu0 %v299_v51  ;;  %2199 = vmatprep.subr.mxu1 %v2414_v3 }
  0x7d   : > { %1264 = vmatprep.mubr.bf16.mxu0 %v2343_v54  ;;  %2165 = vmatpush3.msra.mxu0 %v1366_v61 }
  0x7e   : > { %2155 = vmatmul.mubr.bf16.gmra.mxu1 %v1022_v4  ;;  %2166 = vmatprep.subr.mxu0 %v2414_v3 }
  0x7f   : > { %2200 = vmatpush3.msra.mxu1 %v1366_v61  ;;  %2167 = vmatpush3.msra.mxu0 %v1365_v10 }
  0x80   : > { %2201 = vmatprep.subr.mxu1 %v2414_v3  ;;  %2168 = vmatprep.subr.mxu0 %v2414_v3 }
  0x81   : > { %2202 = vmatpush3.msra.mxu1 %v1365_v10  ;;  %2169 = vmatpush3.msra.mxu0 %v1364_v11 }
  0x82   : > { %2203 = vmatprep.subr.mxu1 %v2414_v3  ;;  %2170 = vmatprep.subr.mxu0 %v2414_v3 }
  0x83   : > { %2204 = vmatpush3.msra.mxu1 %v1364_v11  ;;  %2171 = vmatpush3.msra.mxu0 %v1363_v12 }
  0x84   : > { %1265 = vmatmul.mubr.bf16.gmra.mxu0 %v302_v59  ;;  %2205 = vmatprep.subr.mxu1 %v2414_v3 }
  0x85   : > { %1272 = vmatprep.mubr.bf16.mxu0 %v1021_v6  ;;  %2206 = vmatpush3.msra.mxu1 %v1363_v12 }
  0x86   : > { %2172 = vmatprep.subr.mxu0 %v2414_v3  ;;  %2207 = vmatprep.subr.mxu1 %v2414_v3 }
  0x87   : > { %2173 = vmatpush3.msra.mxu0 %v1362_v13  ;;  %2208 = vmatpush3.msra.mxu1 %v1362_v13 }
  0x88   : > { %2174 = vmatprep.subr.mxu0 %v2414_v3  ;;  %2209 = vmatprep.subr.mxu1 %v2414_v3 }
  0x89   : > { %2175 = vmatpush3.msra.mxu0 %v1361_v14  ;;  %2210 = vmatpush3.msra.mxu1 %v1361_v14 }
  0x8a   : > { %2176 = vmatprep.subr.mxu0 %v2414_v3  ;;  %2211 = vmatprep.subr.mxu1 %v2414_v3 }
  0x8b   : > { %2177 = vmatpush3.msra.mxu0 %v1360_v15  ;;  %2212 = vmatpush3.msra.mxu1 %v1360_v15 }
  0x8c   : > { %1273 = vmatmul.mubr.bf16.gmra.mxu0 %v1020_v7  ;;  %2178 = vmatprep.subr.mxu0 %v2414_v3 }
  0x8d   : > { %2213 = vmatprep.subr.mxu1 %v2414_v3  ;;  %2179 = vmatpush3.msra.mxu0 %v1359_v16 }
  0x8e   : > { %2214 = vmatpush3.msra.mxu1 %v1359_v16  ;;  %2180 = vmatprep.subr.mxu0 %v2414_v3 }
  0x8f   : > { %2215 = vmatprep.subr.mxu1 %v2414_v3  ;;  %2181 = vmatpush3.msra.mxu0 %v1358_v17 }
  0x90   : > { %2216 = vmatpush3.msra.mxu1 %v1358_v17  ;;  %2182 = vmatprep.subr.mxu0 %v2414_v3 }
  0x91   : > { %2217 = vmatprep.subr.mxu1 %v2414_v3  ;;  %2183 = vmatpush3.msra.mxu0 %v1357_v18 }
  0x92   : > { %2218 = vmatpush3.msra.mxu1 %v1357_v18  ;;  %2184 = vmatprep.subr.mxu0 %v2414_v3 }
  0x93   : > { %2219 = vmatprep.subr.mxu1 %v2414_v3  ;;  %2185 = vmatpush3.msra.mxu0 %v1356_v19 }
  0x94   : > { %2220 = vmatpush3.msra.mxu1 %v1356_v19  ;;  %2186 = vmatprep.subr.mxu0 %v2414_v3 }
  0x95   : > { %2221 = vmatprep.subr.mxu1 %v2414_v3  ;;  %2187 = vmatpush3.msra.mxu0 %v1355_v20 }
  0x96   : > { %2190 = vmatprep.mubr.msk.f32.mxu0 %vm2415_vm0, %v2414_v3  ;;  %2188 = vmatprep.subr.mxu0 %v2414_v3 }
  0x97   : > { %2222 = vmatpush3.msra.mxu1 %v1355_v20  ;;  %2189 = vmatpush3.msra.mxu0 %v1354_v21 }
  0x98   : > { %2223 = vmatprep.subr.mxu1 %v2414_v3  ;;  %2225 = vmatprep.mubr.msk.f32.mxu1 %vm2415_vm0, %v2414_v3 }
  0x99   : > { %2224 = vmatpush3.msra.mxu1 %v1354_v21 }
  0xf4   : > { %v1912_v22 = vpop.f32.mrf.mxu0 }
  0xf6   : > { %v1913_v24 = vpop.f32.mrf.mxu0  ;;  %v2921_v23 = vpop.f32.mrf.mxu1 }
  0xf7   : > { %v2919_v26 = vadd.f32 %v1913_v24, %v1912_v22 }
  0xf8   : > { %v1915_v27 = vpop.f32.mrf.mxu0  ;;  %v681_v33 = vpop.f32.mrf.mxu1 }
  0xfa   : > { %v1916_v28 = vpop.f32.mrf.mxu0  ;;  %v2927_v3 = vpop.f32.mrf.mxu1 }
  0xfb   : > { %v1917_v29 = vadd.f32 %v1916_v28, %v1915_v27 }
  0xfc   : > { %v1918_v30 = vpop.f32.mrf.mxu0  ;;  %v684_v41 = vpop.f32.mrf.mxu1 }
  0xfd   : > { %v685_v28 = vadd.f32 %v1917_v29, %v684_v41 }
  0xfe   : > { %v1919_v25 = vpop.f32.mrf.mxu0  ;;  %v2933_v44 = vpop.f32.mrf.mxu1 }
  0xff   : > { %v2923_v31 = vadd.f32 %v1919_v25, %v1918_v30 }
 0x100   : > { %v1921_v32 = vpop.f32.mrf.mxu0  ;;  %v697_v47 = vpop.f32.mrf.mxu1 }
 0x102   : > { %v1922_v34 = vpop.f32.mrf.mxu0  ;;  %v2943_v50 = vpop.f32.mrf.mxu1 }
 0x103   : > { %v2925_v37 = vadd.f32 %v1922_v34, %v1921_v32  ;;  %v682_v34 = vadd.f32 %v2919_v26, %v681_v33 }
 0x104   : > { %v1924_v38 = vpop.f32.mrf.mxu0  ;;  %v2945_v53 = vpop.f32.mrf.mxu1 }
 0x106   : > { %v1925_v40 = vpop.f32.mrf.mxu0 }
 0x107   : > { %v2929_v35 = vadd.f32 %v1925_v40, %v1924_v38 }
 0x108   : > { %v1927_v39 = vpop.f32.mrf.mxu0 }
 0x109   : > { %v698_v26 = vadd.f32 %v2929_v35, %v697_v47 }
 0x10a   : > { %v1928_v42 = vpop.f32.mrf.mxu0 }
 0x10b   : > { %v2931_v43 = vadd.f32 %v1928_v42, %v1927_v39  ;;  %v690_v39 = vadd.f32 %v2921_v23, %v2923_v31 }
 0x10c   : > { %v2935_v45 = vpop.f32.mrf.mxu0 }
 0x10e   : > { %v2937_v46 = vpop.f32.mrf.mxu0 }
 0x10f   : > { %v1932_v33 = vadd.f32 %v2937_v46, %v2935_v45 }
 0x110   : > { %v2939_v36 = vpop.f32.mrf.mxu0 }
 0x111   : > { %v706_v46 = vadd.f32 %v2933_v44, %v1932_v33 }
 0x112   : > { %v2941_v48 = vpop.f32.mrf.mxu0 }
 0x114   : > { %v1964_v51 = vpop.f32.mrf.mxu0 }
 0x116   : > { %v1965_v52 = vpop.f32.mrf.mxu0  ;;  %v2947_v55 = vpop.f32.mrf.mxu1 }
 0x117   : > { %v1966_v30 = vadd.f32 %v1965_v52, %v1964_v51 }
 0x118   : > { %v1967_v54 = vpop.f32.mrf.mxu0  ;;  %v2949_v57 = vpop.f32.mrf.mxu1 }
 0x119   : > { %v891_v29 = vadd.f32 %v1966_v30, %v682_v34 }
 0x11a   : > { %v1968_v49 = vpop.f32.mrf.mxu0  ;;  %v2951_v62 = vpop.f32.mrf.mxu1 }
 0x11b   : > { %v1969_v22 = vadd.f32 %v1968_v49, %v1967_v54  ;;  %v693_v54 = vadd.f32 %v2927_v3, %v2925_v37  ;;  %v701_v37 = vadd.f32 %v2931_v43, %v2945_v53 }
 0x11c   : > { %v1970_v56 = vpop.f32.mrf.mxu0  ;;  %v958_v1 = vpop.f32.mrf.mxu1 }
 0x11d   : > { %v894_v42 = vadd.f32 %v1969_v22, %v685_v28 }
 0x11e   : > { %v1971_v59 = vpop.f32.mrf.mxu0  ;;  %v2953_v5 = vpop.f32.mrf.mxu1 }
 0x11f   : > { %3066 = vst [vmem:[#allocation6_spill] sm:$0xff] %v2953_v5  ;;  %v1972_v25 = vadd.f32 %v1971_v59, %v1970_v56  ;;  %v959_v59 = vadd.f32 %v958_v1, %v894_v42  ;;  %v1935_v1 = vadd.f32 %v2941_v48, %v2939_v36 }
 0x120   : > { %v1973_v60 = vpop.f32.mrf.mxu0  ;;  %v2955_v7 = vpop.f32.mrf.mxu1 }
 0x121   : > { %v899_v41 = vadd.f32 %v1972_v25, %v690_v39  ;;  %v709_v36 = vadd.f32 %v2943_v50, %v1935_v1 }
 0x122   : > { %v1974_v63 = vpop.f32.mrf.mxu0  ;;  %v2957_v58 = vpop.f32.mrf.mxu1 }
 0x123   : > { %3067 = vst [vmem:[#allocation7_spill] sm:$0xff] %v2957_v58  ;;  %v1975_v38 = vadd.f32 %v1974_v63, %v1973_v60  ;;  %v964_v35 = vadd.f32 %v2947_v55, %v899_v41 }
 0x124   : > { %v1976_v0 = vpop.f32.mrf.mxu0  ;;  %v2963_v11 = vpop.f32.mrf.mxu1 }
 0x125   : > { %3068 = vst [vmem:[#allocation8_spill] sm:$0xff] %v2963_v11  ;;  %v902_v56 = vadd.f32 %v1975_v38, %v693_v54 }
 0x126   : > { %v1977_v2 = vpop.f32.mrf.mxu0  ;;  %v3071_v22 = vld [vmem:[#allocation6_spill] sm:$0xff] }
 0x127   : > { %v1978_v49 = vadd.f32 %v1977_v2, %v1976_v0 }
 0x128   : > { %v1979_v4 = vpop.f32.mrf.mxu0 }
 0x129   : > { %v907_v3 = vadd.f32 %v1978_v49, %v698_v26 }
 0x12a   : > { %v1980_v6 = vpop.f32.mrf.mxu0 }
 0x12b   : > { %v1981_v23 = vadd.f32 %v1980_v6, %v1979_v4  ;;  %v967_v4 = vadd.f32 %v2951_v62, %v902_v56 }
 0x12c   : > { %v1982_v8 = vpop.f32.mrf.mxu0  ;;  %v3070_v62 = vld [vmem:[#allocation8_spill] sm:$0xff] }
 0x12e   : > { %v1983_v9 = vpop.f32.mrf.mxu0 }
 0x12f   : > { %v1984_v0 = vadd.f32 %v1983_v9, %v1982_v8 }
 0x130   : > { %v2959_v61 = vpop.f32.mrf.mxu0 }
 0x132   : > { %v2961_v10 = vpop.f32.mrf.mxu0 }
 0x134   : > { %v2016_v12 = vpop.f32.mrf.mxu0 }
 0x136   : > { %v2017_v13 = vpop.f32.mrf.mxu0  ;;  %v2152_v14 = vpop.f32.mrf.mxu1 }
 0x137   : > { %v2018_v58 = vadd.f32 %v2017_v13, %v2016_v12 }
 0x138   : > { %v2019_v15 = vpop.f32.mrf.mxu0  ;;  %v1315_v16 = vpop.f32.mrf.mxu1 }
 0x139   : > { %v1316_v60 = vadd.f32 %v2018_v58, %v1315_v16  ;;  %v972_v58 = vadd.f32 %v2955_v7, %v907_v3 }
 0x13a   : > { %v2020_v17 = vpop.f32.mrf.mxu0  ;;  %v2153_v18 = vpop.f32.mrf.mxu1 }
 0x13b   : > { %v2021_v32 = vadd.f32 %v2020_v17, %v2019_v15  ;;  %v956_v15 = vadd.f32 %v2949_v57, %v891_v29  ;;  %v915_v57 = vadd.f32 %v1984_v0, %v706_v46 }
 0x13c   : > { %v2022_v19 = vpop.f32.mrf.mxu0  ;;  %v1318_v20 = vpop.f32.mrf.mxu1 }
 0x13d   : > { %v1319_v51 = vadd.f32 %v2021_v32, %v1318_v20  ;;  %v1346_v43 = vadd.f32 %v1316_v60, %v956_v15 }
 0x13e   : > { %v2023_v21 = vpop.f32.mrf.mxu0  ;;  %v2965_v27 = vpop.f32.mrf.mxu1 }
 0x13f   : > { %3069 = vst [vmem:[#allocation9_spill] sm:$0xff] %v2965_v27  ;;  %v2024_v5 = vadd.f32 %v2023_v21, %v2022_v19  ;;  %v1347_v47 = vadd.f32 %v1319_v51, %v959_v59 }
 0x140   : > { %v2025_v24 = vpop.f32.mrf.mxu0  ;;  %v1331_v27 = vpop.f32.mrf.mxu1 }
 0x141   : > { %v1324_v63 = vadd.f32 %v2152_v14, %v2024_v5  ;;  %v910_v5 = vadd.f32 %v1981_v23, %v701_v37  ;;  %v1987_v14 = vadd.f32 %v2961_v10, %v2959_v61  ;;  %v1370_v44 = vadd.f32 %v1347_v47, %v1346_v43 }
 0x142   : > { %v2026_v40 = vpop.f32.mrf.mxu0  ;;  %v2157_v13 = vpop.f32.mrf.mxu1  ;;  %v1453_v23 = vlaneseq }
 0x143   : > { %v2027_v52 = vadd.f32 %v2026_v40, %v2025_v24  ;;  %v1348_v53 = vadd.f32 %v1324_v63, %v964_v35  ;;  %v980_v24 = vadd.f32 %v3071_v22, %v915_v57  ;;  %v3073_v40 = vld [vmem:[#allocation7_spill] sm:$0xff] }
 0x144   : > { %v2028_v11 = vpop.f32.mrf.mxu0 }
 0x145   : > { %v1327_v45 = vadd.f32 %v2153_v18, %v2027_v52  ;;  %v975_v18 = vadd.f32 %v3070_v62, %v910_v5  ;;  %v1371_v19 = vadd.f32 %v1370_v44, %v1348_v53 }
 0x146   : > { %v2029_v31 = vpop.f32.mrf.mxu0  ;;  %v3072_v25 = vld [vmem:[#allocation9_spill] sm:$0xff] }
 0x147   : > { %v2030_v12 = vadd.f32 %v2029_v31, %v2028_v11  ;;  %v1334_v11 = vpop.f32.mrf.mxu1  ;;  %v1349_v16 = vadd.f32 %v1327_v45, %v967_v4  ;;  %v1454_v31 = vshrl.u32 %v1453_v23, 7 }
 0x148   : > { %v2031_v2 = vpop.f32.mrf.mxu0 }
 0x149   : > { %v1332_v8 = vadd.f32 %v2030_v12, %v1331_v27  ;;  %v918_v27 = vadd.f32 %v1987_v14, %v709_v36  ;;  %v1372_v28 = vadd.f32 %v1371_v19, %v1349_v16  ;;  %v1455_v59 = vsub.s32 0, %v1454_v31 }
 0x14a   : > { %v2032_v6 = vpop.f32.mrf.mxu0 }
 0x14b   : > { %v2033_v9 = vadd.f32 %v2032_v6, %v2031_v2  ;;  %v1350_v20 = vadd.f32 %v1332_v8, %v972_v58  ;;  %v983_v50 = vadd.f32 %v3073_v40, %v918_v27  ;;  %v1869_v27 = vld [vmem:[%s3061_s3] ss:$0 sm:$0xff] }
 0x14c   : > { %v2034_v55 = vpop.f32.mrf.mxu0 }
 0x14d   : > { %v1335_v17 = vadd.f32 %v2033_v9, %v1334_v11  ;;  %v1373_v10 = vadd.f32 %v1372_v28, %v1350_v20 }
 0x14e   : > { %v2035_v48 = vpop.f32.mrf.mxu0 }
 0x14f   : > { %v2036_v21 = vadd.f32 %v2035_v48, %v2034_v55  ;;  %v1351_v30 = vadd.f32 %v1335_v17, %v975_v18 }
 0x150   : > { %v2037_v7 = vpop.f32.mrf.mxu0 }
 0x151   : > { %v1340_v32 = vadd.f32 %v3072_v25, %v2036_v21  ;;  %v1374_v39 = vadd.f32 %v1373_v10, %v1351_v30  ;;  %v1557_v21 = vld [vmem:[%s3060_s2] sm:$0x1] }
 0x152   : > { %v2038_v61 = vpop.f32.mrf.mxu0 }
 0x153   : > { %v1352_v34 = vadd.f32 %v1340_v32, %v980_v24  ;;  %v2039_v38 = vadd.f32 %v2038_v61, %v2037_v7 }
 0x155   : > { %v1343_v42 = vadd.f32 %v2157_v13, %v2039_v38  ;;  %v1375_v54 = vadd.f32 %v1374_v39, %v1352_v34 }
 0x157   : > { %v1353_v49 = vadd.f32 %v1343_v42, %v983_v50 }
 0x159   : > { %v1376_v29 = vadd.f32 %v1375_v54, %v1353_v49 }
 0x15b   : > { %v1377_v41 = vrot.slane %v1376_v29, 4 }
 0x15d   : > { %v1378_v51 = vadd.f32 %v1377_v41, %v1376_v29 }
 0x15f   : > { %v1379_v52 = vrot.slane %v1378_v51, 2 }
 0x161   : > { %v1380_v26 = vadd.f32 %v1379_v52, %v1378_v51 }
 0x163   : > { %v1381_v33 = vrot.slane %v1380_v26, 1 }
 0x165   : > { %v1382_v56 = vadd.f32 %v1381_v33, %v1380_v26 }
 0x167   : > { %2191 = vmatmul.mubr.f32.vlgmr.msra.gmra.mxu0 %v1382_v56 }
 0x227   : > { %v1449_v60 = vpop.f32.mrf.mxu0 }
 0x228   : > { %v1456_v63 = vrot.slane %v1449_v60, %v1455_v59 }
 0x229   : > { %v2192_v12 = vpop.f32.mrf.mxu0 }
 0x22a   : > { %v1457_v37 = vsub.f32 %v1346_v43, %v1456_v63  ;;  %v1458_v3 = vsub.f32 %v1347_v47, %v1456_v63  ;;  %v1459_v0 = vsub.f32 %v1348_v53, %v1456_v63  ;;  %v1460_v2 = vsub.f32 %v1349_v16, %v1456_v63 }
 0x22b   : > { %v1461_v35 = vsub.f32 %v1350_v20, %v1456_v63  ;;  %v1462_v1 = vsub.f32 %v1351_v30, %v1456_v63  ;;  %v1463_v6 = vsub.f32 %v1352_v34, %v1456_v63  ;;  %v1464_v58 = vsub.f32 %v1353_v49, %v1456_v63 }
 0x22c   : > { %v1465_v13 = vmul.f32 %v1457_v37, %v1457_v37  ;;  %v1466_v15 = vmul.f32 %v1458_v3, %v1458_v3  ;;  %v1467_v45 = vmul.f32 %v1459_v0, %v1459_v0  ;;  %v1468_v4 = vmul.f32 %v1460_v2, %v1460_v2 }
 0x22d   : > { %v1469_v8 = vmul.f32 %v1461_v35, %v1461_v35  ;;  %v1470_v57 = vmul.f32 %v1462_v1, %v1462_v1  ;;  %v1471_v55 = vmul.f32 %v1463_v6, %v1463_v6  ;;  %v1472_v43 = vmul.f32 %v1464_v58, %v1464_v58 }
 0x22e   : > { %v1473_v46 = vadd.f32 %v1466_v15, %v1465_v13 }
 0x230   : > { %v1474_v5 = vadd.f32 %v1473_v46, %v1467_v45 }
 0x232   : > { %v1475_v9 = vadd.f32 %v1474_v5, %v1468_v4 }
 0x234   : > { %v1476_v11 = vadd.f32 %v1475_v9, %v1469_v8 }
 0x236   : > { %v1477_v14 = vadd.f32 %v1476_v11, %v1470_v57 }
 0x238   : > { %v1478_v47 = vadd.f32 %v1477_v14, %v1471_v55 }
 0x23a   : > { %v1479_v53 = vadd.f32 %v1478_v47, %v1472_v43 }
 0x23c   : > { %v1480_v44 = vrot.slane %v1479_v53, 4 }
 0x23e   : > { %v1481_v16 = vadd.f32 %v1480_v44, %v1479_v53 }
 0x240   : > { %v1482_v17 = vrot.slane %v1481_v16, 2 }
 0x242   : > { %v1483_v36 = vadd.f32 %v1482_v17, %v1481_v16 }
 0x244   : > { %v1484_v48 = vrot.slane %v1483_v36, 1 }
 0x246   : > { %v1485_v62 = vadd.f32 %v1484_v48, %v1483_v36 }
 0x248   : > { %2226 = vmatmul.mubr.f32.vlgmr.msra.gmra.mxu1 %v1485_v62 }
 0x308   : > { %v1552_v18 = vpop.f32.mrf.mxu1 }
 0x309   : > { %v1553_v19 = vadd.f32 1e-05, %v1552_v18 }
 0x30a   : > { %v2227_v20 = vpop.f32.mrf.mxu1 }
 0x30b   : > { %2350 = vrsqrt.f32 %v1553_v19 }
 0x318   : > { %v2351_v22 = vpop.eup %2350 }
 0x319   : > { %v1558_v24 = vmul.f32 %v2351_v22, %v1557_v21 }
 0x31b   : > { %v1562_v7 = vrot.slane %v1558_v24, %v1455_v59 }
 0x31d   : > { %v1563_v28 = vmul.f32 %v1562_v7, %v1457_v37  ;;  %v1564_v30 = vmul.f32 %v1562_v7, %v1458_v3  ;;  %v1565_v25 = vmul.f32 %v1562_v7, %v1459_v0  ;;  %v1566_v32 = vmul.f32 %v1562_v7, %v1460_v2 }
 0x31e   : > { %v1567_v61 = vmul.f32 %v1562_v7, %v1461_v35  ;;  %v1568_v10 = vmul.f32 %v1562_v7, %v1462_v1  ;;  %v1569_v34 = vmul.f32 %v1562_v7, %v1463_v6  ;;  %v1570_v38 = vmul.f32 %v1562_v7, %v1464_v58 }
 0x31f   : > { %v1578_v40 = vadd.f32 %v1869_v27, %v1563_v28  ;;  %v1579_v50 = vadd.f32 %v1869_v27, %v1564_v30  ;;  %v1580_v39 = vadd.f32 %v1869_v27, %v1565_v25  ;;  %v1581_v42 = vadd.f32 %v1869_v27, %v1566_v32 }
 0x320   : > { %v1582_v54 = vadd.f32 %v1869_v27, %v1567_v61  ;;  %v1583_v49 = vadd.f32 %v1869_v27, %v1568_v10  ;;  %v1584_v29 = vadd.f32 %v1869_v27, %v1569_v34  ;;  %v1585_v41 = vadd.f32 %v1869_v27, %v1570_v38 }
 0x321   : > { %vm1586_vm1 = vcmp.gt.f32.partialorder %v1578_v40, 0.0  ;;  %vm1587_vm2 = vcmp.gt.f32.partialorder %v1579_v50, 0.0  ;;  %vm1588_vm3 = vcmp.gt.f32.partialorder %v1580_v39, 0.0  ;;  %vm1589_vm4 = vcmp.gt.f32.partialorder %v1581_v42, 0.0 }
 0x322   : > { %vm1590_vm5 = vcmp.gt.f32.partialorder %v1582_v54, 0.0  ;;  %vm1591_vm6 = vcmp.gt.f32.partialorder %v1583_v49, 0.0  ;;  %vm1592_vm7 = vcmp.gt.f32.partialorder %v1584_v29, 0.0  ;;  %vm1593_vm8 = vcmp.gt.f32.partialorder %v1585_v41, 0.0 }
 0x323   : > { %v1594_v51 = vmul.f32 0.01, %v1578_v40  ;;  %v1595_v52 = vmul.f32 0.01, %v1579_v50  ;;  %v1596_v26 = vmul.f32 0.01, %v1580_v39 }
 0x324   : > { %v1597_v33 = vmul.f32 0.01, %v1581_v42  ;;  %v1598_v56 = vmul.f32 0.01, %v1582_v54  ;;  %v1599_v23 = vmul.f32 0.01, %v1583_v49 }
 0x325   : > { %v1600_v31 = vmul.f32 0.01, %v1584_v29  ;;  %v1601_v59 = vmul.f32 0.01, %v1585_v41  ;;  %v1602_v60 = vsel %vm1586_vm1, %v1578_v40, %v1594_v51  ;;  %v1603_v63 = vsel %vm1587_vm2, %v1579_v50, %v1595_v52 }
 0x326   : > { %v1604_v12 = vsel %vm1588_vm3, %v1580_v39, %v1596_v26  ;;  %v1605_v37 = vsel %vm1589_vm4, %v1581_v42, %v1597_v33  ;;  %v1606_v3 = vsel %vm1590_vm5, %v1582_v54, %v1598_v56  ;;  %v1607_v0 = vsel %vm1591_vm6, %v1583_v49, %v1599_v23  ;;  %1610 = vst [vmem:[%s217_s6] sm:$0xff] %v1602_v60 }
 0x327   : > { %1611 = vst [vmem:[%s217_s6 + $0x8] sm:$0xff] %v1603_v63  ;;  %v1608_v2 = vsel %vm1592_vm7, %v1584_v29, %v1600_v31  ;;  %v1609_v13 = vsel %vm1593_vm8, %v1585_v41, %v1601_v59  ;;  %1612 = vst [vmem:[%s217_s6 + $0x10] sm:$0xff] %v1604_v12 }
 0x328   : > { %1613 = vst [vmem:[%s217_s6 + $0x18] sm:$0xff] %v1605_v37  ;;  %1614 = vst [vmem:[%s217_s6 + $0x20] sm:$0xff] %v1606_v3 }
 0x329   : > { %1615 = vst [vmem:[%s217_s6 + $0x28] sm:$0xff] %v1607_v0  ;;  %1616 = vst [vmem:[%s217_s6 + $0x30] sm:$0xff] %v1608_v2 }
 0x32a   : > { %1617 = vst [vmem:[%s217_s6 + $0x38] sm:$0xff] %v1609_v13 }
 0x32b   : > { %2365 = shalt.err (!%p2362_p3)
}
 0x32c   : > { %s2366_s15 = scalar_lea.hbm %s3006_s9, 1024  ;;  %s2370_s25 = scalar_lea.hbm %s3063_s5, 2048 }
 0x32d   : > { %p2367_p4 = scmp.ne.s32.totalorder %s3006_s9, %s2366_s15  ;;  %p2371_p9 = scmp.lt.s32.totalorder %s3006_s9, %s3063_s5 }
 0x32e   : > { %p2372_p10 = scmp.lt.s32.totalorder %s2370_s25, %s2366_s15 }
 0x32f   : > { %p2368_p7 = pnand %p2367_p4, %p2487_p5 }
 0x330   : > { %p2373_p11 = por %p2372_p10, %p2371_p9 }
 0x331   : > { %p2369_p8 = pneg %p2368_p7 }
 0x333   : > { %p2374_p12 = pnand %p2373_p11, %p2369_p8 }
 0x335   : > { %2377 = shalt.err (!%p2374_p12)
}
 0x336   : > { %s2417_s30 = smov 128   ;;  %s2418_s6 = smov 8  }
 0x337   : > { %2228 = dma.vmem_to_hbm [thread:$0]  (%p2487_p5), %s3008_s7, 1024, %s3006_s9, %s3018_s10, %s2417_s30, %s2417_s30, %s2418_s6  }
 0x338 PF: > { %p2234_p13 = scmp.ge.s32.totalorder %s2412_s21, 2  ;;  %s1647_s8 = sand.u32 1, %s2400_s18  }
 0x339   : > { %s1648_s22 = scalar_lea.sflag [#allocation4], %s1647_s8 }
 0x33a   : > { %p2231_p0 = pnand %p2234_p13, %p2491_p6 }
 0x33c   : > { %p2232_p1 = pneg %p2231_p0 }
 0x33e   : > { %2395 = dma.done.wait (%p2232_p1), %s1648_s22, 1024  }
 0x33f   : > { %2397 = vsyncadd (%p2232_p1), %s1648_s22, 4294966272  ;;  %p15_p2 = scmp.ge.s32.totalorder %s2474_s24, 4   ;;  %s3074_s18 = smov %s2404_s19 }
 0x340   : > { %s3075_s19 = smov %s2408_s20  ;;  %s3076_s20 = smov %s2485_s27 }
 0x341   : > { %s3077_s21 = smov %s2474_s24  ;;  %17 = sbr.rel (!%p15_p2) target bundleno = 3 (0x3), region = 79 }
 0x346   :  { %1653 = vsyncpa [#allocation4], 1 }
 0x347   :  { %1655 = vsyncpa [#allocation4 + $0x1], 1 }

</bundles_post_ra>
